<compile_context>
chip_gen: v6e
topology: v6e:2x2x1
jax: 0.10.0
libtpu: 0.0.40
codegen_flags: <defaults>
</compile_context>

<pallas_src>
import functools

import jax
import jax.numpy as jnp
from jax.experimental import pallas as pl
from jax.experimental.pallas import tpu as pltpu

DILATIONS = (1, 3, 5)
GN_EPS = 1e-5


def _dmc_kernel(gx_ref, pp_ref, bh_ref, bw_ref, a1_ref, mt_ref, g_ref, cm_ref,
                rowp_ref, out_ref, xpad_ref, *, h, w, pad, rows, hw):
    f32 = jnp.float32
    pv = pad + 1  # vertical zero-pad rows in the flat scratch

    x = gx_ref[...].astype(f32)                              # (rows, hw)

    # --- build the vertically zero-padded flat copy used by the dilated convs
    xpad_ref[...] = jnp.zeros_like(xpad_ref)
    xpad_ref[:, pl.ds(pv * w, hw)] = x

    # --- pool_h / pool_w (one MXU matmul) + shared 1x1 conv + sigmoid gates --
    pooled = jnp.dot(x, pp_ref[...], preferred_element_type=f32)     # (rows, h+w)
    mixed = jnp.dot(a1_ref[...], pooled, preferred_element_type=f32)  # channel mix
    mixed = mixed + rowp_ref[:, 2:3]                                  # + b1 per row
    sig = jax.nn.sigmoid(mixed)
    gate_h = jnp.dot(sig[:, :h], bh_ref[...], preferred_element_type=f32)
    gate_w = jnp.dot(sig[:, h:], bw_ref[...], preferred_element_type=f32)
    pre = x * gate_h * gate_w

    # --- GroupNorm(cg, cg): per-(batch-group, channel) == per-row norm -------
    mu = jnp.mean(pre, axis=1, keepdims=True)
    cen = pre - mu
    var = jnp.mean(cen * cen, axis=1, keepdims=True)
    x1 = cen * jax.lax.rsqrt(var + GN_EPS)
    x1 = x1 * rowp_ref[:, 0:1] + rowp_ref[:, 1:2]                     # gamma, beta

    # --- fused dilated 3x3 convs + concat 1x1 conv: 27 MXU taps --------------
    acc = jnp.zeros((rows, hw), f32)
    t = 0
    for d in DILATIONS:
        for ky in range(3):
            dy = d * (ky - 1)
            for kx in range(3):
                dx = d * (kx - 1)
                start = (pv + dy) * w + dx
                shifted = xpad_ref[:, pl.ds(start, hw)]               # (rows, hw)
                shifted = shifted * cm_ref[t]                         # kill h-wrap
                acc = acc + jnp.dot(mt_ref[t], shifted,
                                    preferred_element_type=f32)
                t += 1
    x2 = acc + rowp_ref[:, 3:4]                                       # fused bias

    # --- channel attention: agp -> per-group softmax -> cross gating ---------
    a1 = jnp.mean(x1, axis=1, keepdims=True)                          # (rows, 1)
    a2 = jnp.mean(x2, axis=1, keepdims=True)
    m1 = jnp.max(a1, axis=0, keepdims=True)
    m2 = jnp.max(a2, axis=0, keepdims=True)
    m = jnp.maximum(m1, m2)        # global shift: valid for softmax, no reshapes
    e1 = jnp.exp(a1 - m)
    e2 = jnp.exp(a2 - m)

    ones_hw = jnp.ones((1, hw), f32)
    g = g_ref[...]                                                    # I_BT (x) 1
    num1 = jnp.dot(g, e1 * x2, preferred_element_type=f32)
    num2 = jnp.dot(g, e2 * x1, preferred_element_type=f32)
    den1 = jnp.dot(g, e1 * ones_hw, preferred_element_type=f32)
    den2 = jnp.dot(g, e2 * ones_hw, preferred_element_type=f32)
    # exact reciprocal: approx=True would risk the 1e-3 tolerance for ~0 gain.
    weights = num1 * pl.reciprocal(den1) + num2 * pl.reciprocal(den2)

    out_ref[...] = (x * jax.nn.sigmoid(weights)).astype(out_ref.dtype)


def _pick_block_bg(bg, cg):
    """Largest divisor BT of bg giving a legal sublane block, preferring a grid
    with >= 2 steps (keeps both v7x TensorCores busy)."""
    valid = []
    for bt in range(1, bg + 1):
        if bg % bt:
            continue
        rows = bt * cg
        if rows % 8 != 0 and rows != bg * cg:
            continue
        if rows > 512:
            continue
        valid.append(bt)
    if not valid:
        return bg
    multi = [bt for bt in valid if bg // bt >= 2]
    return max(multi) if multi else max(valid)


def _const_spec(arr):
    ndim = arr.ndim
    return pl.BlockSpec(arr.shape, lambda i: (0,) * ndim)


def dmc_forward(x, params, *, factor):
    """Pallas implementation of DMC.forward.  x: (b, c, h, w) float32."""
    b, c, h, w = x.shape
    assert c % factor == 0
    cg = c // factor
    bg = b * factor
    hw = h * w
    nd = len(DILATIONS)
    pad = max(DILATIONS)
    pv = pad + 1
    pw_flat = (h + 2 * pv) * w

    bt = _pick_block_bg(bg, cg)
    rows = bt * cg
    grid = (bg // bt,)
    f32 = jnp.float32

    # ---- structural (data independent) matrices -----------------------------
    p_idx = jnp.arange(hw, dtype=jnp.int32)
    row_of_p = p_idx // w
    col_of_p = p_idx % w
    ph = (row_of_p[:, None] == jnp.arange(h)[None, :]).astype(f32) / w
    pw_m = (col_of_p[:, None] == jnp.arange(w)[None, :]).astype(f32) / h
    pp = jnp.concatenate([ph, pw_m], axis=1)                       # (hw, h+w)
    bh = (jnp.arange(h)[:, None] == row_of_p[None, :]).astype(f32)  # (h, hw)
    bw = (jnp.arange(w)[:, None] == col_of_p[None, :]).astype(f32)  # (w, hw)

    eye_bt = jnp.eye(bt, dtype=f32)
    a1m = jnp.kron(eye_bt, params["w1"].astype(f32))                # (rows, rows)
    gmat = jnp.kron(eye_bt, jnp.ones((cg, cg), f32))                # (rows, rows)

    # ---- fused dilated-conv + concat-1x1 tap matrices & column masks --------
    wc3 = params["wc"].reshape(cg, nd, cg).astype(f32)              # (o, d, m)
    wd = params["wd"].astype(f32)                                   # (d, m, c, 3, 3)
    mtaps, cmask = [], []
    for di, d in enumerate(DILATIONS):
        wc_d = wc3[:, di, :]                                        # (o, m)
        for ky in range(3):
            for kx in range(3):
                wt = wc_d @ wd[di, :, :, ky, kx]                    # (o, c)
                mtaps.append(jnp.kron(eye_bt, wt))
                dx = d * (kx - 1)
                valid = ((col_of_p + dx >= 0) & (col_of_p + dx < w)).astype(f32)
                cmask.append(valid.reshape(1, hw))
    mtaps = jnp.stack(mtaps, axis=0)                                # (27, rows, rows)
    cmask = jnp.stack(cmask, axis=0)                                # (27, 1, hw)

    # ---- per-row parameter vectors: [gamma, beta, b1, fused conv bias] ------
    b2 = params["bc"].astype(f32) + jnp.einsum(
        'odm,dm->o', wc3, params["bd"].astype(f32))
    rowp = jnp.stack([
        jnp.tile(params["gamma"].astype(f32), bt),
        jnp.tile(params["beta"].astype(f32), bt),
        jnp.tile(params["b1"].astype(f32), bt),
        jnp.tile(b2, bt),
    ], axis=1)                                                      # (rows, 4)

    gx2d = x.reshape(bg * cg, hw)                                   # free reshape

    kernel = functools.partial(_dmc_kernel, h=h, w=w, pad=pad, rows=rows, hw=hw)

    out2d = pl.pallas_call(
        kernel,
        out_shape=jax.ShapeDtypeStruct((bg * cg, hw), x.dtype),
        grid=grid,
        in_specs=[
            pl.BlockSpec((rows, hw), lambda i: (i, 0)),
            _const_spec(pp), _const_spec(bh), _const_spec(bw),
            _const_spec(a1m), _const_spec(mtaps), _const_spec(gmat),
            _const_spec(cmask), _const_spec(rowp),
        ],
        out_specs=pl.BlockSpec((rows, hw), lambda i: (i, 0)),
        scratch_shapes=[pltpu.VMEM((rows, pw_flat), jnp.float32)],
        compiler_params=pltpu.CompilerParams(
            dimension_semantics=("parallel",)),
    )(gx2d, pp, bh, bw, a1m, mtaps, gmat, cmask, rowp)

    return out2d.reshape(b, c, h, w)


def dmc_reference(x, p, *, factor):
    """Pure-JAX reference matching the PyTorch forward exactly."""
    b, c, h, w = x.shape
    cg = c // factor
    bg = b * factor
    gx = x.reshape(bg, cg, h, w)

    x_h = jnp.mean(gx, axis=3, keepdims=True)                       # (bg,cg,h,1)
    x_w = jnp.mean(gx, axis=2, keepdims=True)                       # (bg,cg,1,w)
    hw_in = jnp.concatenate([x_h, jnp.transpose(x_w, (0, 1, 3, 2))], axis=2)
    hw = jnp.einsum('oc,bcpq->bopq', p["w1"], hw_in) + p["b1"][None, :, None, None]
    xh2, xw2 = hw[:, :, :h], hw[:, :, h:]

    pre = gx * jax.nn.sigmoid(xh2) * jax.nn.sigmoid(jnp.transpose(xw2, (0, 1, 3, 2)))
    mu = jnp.mean(pre, axis=(2, 3), keepdims=True)
    var = jnp.mean((pre - mu) ** 2, axis=(2, 3), keepdims=True)
    x1 = (pre - mu) / jnp.sqrt(var + GN_EPS)
    x1 = x1 * p["gamma"][None, :, None, None] + p["beta"][None, :, None, None]

    feats = []
    for di, d in enumerate(DILATIONS):
        y = jax.lax.conv_general_dilated(
            gx, p["wd"][di], window_strides=(1, 1),
            padding=((d, d), (d, d)), rhs_dilation=(d, d),
            dimension_numbers=('NCHW', 'OIHW', 'NCHW'))
        feats.append(y + p["bd"][di][None, :, None, None])
    cat = jnp.concatenate(feats, axis=1)
    x2 = jnp.einsum('oc,bchw->bohw', p["wc"], cat) + p["bc"][None, :, None, None]

    p1 = jax.nn.softmax(jnp.mean(x1, axis=(2, 3)), axis=-1)         # (bg, cg)
    p2 = jax.nn.softmax(jnp.mean(x2, axis=(2, 3)), axis=-1)
    weights = (jnp.einsum('bc,bchw->bhw', p1, x2) +
               jnp.einsum('bc,bchw->bhw', p2, x1))[:, None]
    out = gx * jax.nn.sigmoid(weights)
    return out.reshape(b, c, h, w)


if __name__ == "__main__":
    b, c, h, w = 2, 8, 16, 16
    factor = 4
    cg = c // factor
    nd = len(DILATIONS)

    key = jax.random.PRNGKey(0)
    kx, k0, k1, k2, k3, k4, k5, k6, k7 = jax.random.split(key, 9)
    x = jax.random.normal(kx, (b, c, h, w), jnp.float32)

    raw = {
        "w1": 0.3 * jax.random.normal(k0, (cg, cg), jnp.float32),
        "b1": 0.1 * jax.random.normal(k1, (cg,), jnp.float32),
        "wd": 0.2 * jax.random.normal(k2, (nd, cg, cg, 3, 3), jnp.float32),
        "bd": 0.1 * jax.random.normal(k3, (nd, cg), jnp.float32),
        "wc": 0.3 * jax.random.normal(k4, (cg, nd * cg), jnp.float32),
        "bc": 0.1 * jax.random.normal(k5, (cg,), jnp.float32),
        "gamma": 1.0 + 0.1 * jax.random.normal(k6, (cg,), jnp.float32),
        "beta": 0.05 * jax.random.normal(k7, (cg,), jnp.float32),
    }

    out = dmc_forward(x, raw, factor=factor)
    out = jax.block_until_ready(out)

    ref = dmc_reference(x, raw, factor=factor)
    assert out.shape == (b, c, h, w)
    assert jnp.allclose(out, ref, atol=1e-3, rtol=1e-3), (
        "max abs diff = %g" % float(jnp.max(jnp.abs(out - ref))))

    print("KERNEL_OK")
</pallas_src>

<mosaic_0001>
module attributes {stable_mosaic.version = 11 : i64} {
  func.func @_dmc_kernel(%arg0: i32, %arg1: memref<8x256xf32, #tpu.memory_space<vmem>>, %arg2: memref<256x32xf32, #tpu.memory_space<vmem>>, %arg3: memref<16x256xf32, #tpu.memory_space<vmem>>, %arg4: memref<16x256xf32, #tpu.memory_space<vmem>>, %arg5: memref<8x8xf32, #tpu.memory_space<vmem>>, %arg6: memref<27x8x8xf32, #tpu.memory_space<vmem>>, %arg7: memref<8x8xf32, #tpu.memory_space<vmem>>, %arg8: memref<27x1x256xf32, #tpu.memory_space<vmem>>, %arg9: memref<8x4xf32, #tpu.memory_space<vmem>>, %arg10: memref<8x256xf32, #tpu.memory_space<vmem>>, %arg11: memref<8x448xf32, #tpu.memory_space<vmem>>) attributes {dimension_semantics = [#tpu.dimension_semantics<parallel>], iteration_bounds = array<i64: 2>, scalar_prefetch = 0 : i64, scratch_operands = 1 : i64, tpu.core_type = #tpu.core_type<tc>, window_params = [{transform_indices = @transform_0, window_bounds = array<i64: 8, 256>}, {pipeline_mode = #tpu.pipeline_mode<synchronous>, transform_indices = @transform_1, window_bounds = array<i64: 256, 32>}, {pipeline_mode = #tpu.pipeline_mode<synchronous>, transform_indices = @transform_2, window_bounds = array<i64: 16, 256>}, {pipeline_mode = #tpu.pipeline_mode<synchronous>, transform_indices = @transform_3, window_bounds = array<i64: 16, 256>}, {pipeline_mode = #tpu.pipeline_mode<synchronous>, transform_indices = @transform_4, window_bounds = array<i64: 8, 8>}, {pipeline_mode = #tpu.pipeline_mode<synchronous>, transform_indices = @transform_5, window_bounds = array<i64: 27, 8, 8>}, {pipeline_mode = #tpu.pipeline_mode<synchronous>, transform_indices = @transform_6, window_bounds = array<i64: 8, 8>}, {pipeline_mode = #tpu.pipeline_mode<synchronous>, transform_indices = @transform_7, window_bounds = array<i64: 27, 1, 256>}, {pipeline_mode = #tpu.pipeline_mode<synchronous>, transform_indices = @transform_8, window_bounds = array<i64: 8, 4>}, {transform_indices = @transform_9, window_bounds = array<i64: 8, 256>}]} {
    %c0 = arith.constant 0 : index
    %c0_0 = arith.constant 0 : index
    %0 = vector.load %arg1[%c0, %c0_0] : memref<8x256xf32, #tpu.memory_space<vmem>>, vector<8x256xf32>
    %cst = arith.constant 0.000000e+00 : f32
    %1 = vector.broadcast %cst : f32 to vector<8x448xf32>
    %c0_1 = arith.constant 0 : index
    %c0_2 = arith.constant 0 : index
    %2 = vector.load %arg11[%c0_1, %c0_2] : memref<8x448xf32, #tpu.memory_space<vmem>>, vector<8x448xf32>
    tpu.vector_store %arg11[%c0_1, %c0_2], %1 {strides = array<i32>} : memref<8x448xf32, #tpu.memory_space<vmem>>, vector<8x448xf32>,
    %c0_3 = arith.constant 0 : index
    %c96 = arith.constant 96 : index
    %3 = vector.load %arg11[%c0_3, %c96] : memref<8x448xf32, #tpu.memory_space<vmem>>, vector<8x256xf32>
    tpu.vector_store %arg11[%c0_3, %c96], %0 {strides = array<i32>} : memref<8x448xf32, #tpu.memory_space<vmem>>, vector<8x256xf32>,
    %c0_4 = arith.constant 0 : index
    %c0_5 = arith.constant 0 : index
    %4 = vector.load %arg2[%c0_4, %c0_5] : memref<256x32xf32, #tpu.memory_space<vmem>>, vector<256x32xf32>
    %cst_6 = arith.constant dense<0.000000e+00> : vector<8x32xf32>
    %5 = tpu.matmul %0, %4, %cst_6 {dimension_numbers = #tpu.dot_dimension_numbers<[1], [0], [0], [1], [0, 0, 1, 1], [], []>} : vector<8x256xf32>, vector<256x32xf32>, vector<8x32xf32> -> vector<8x32xf32>
    %c0_7 = arith.constant 0 : index
    %c0_8 = arith.constant 0 : index
    %6 = vector.load %arg5[%c0_7, %c0_8] : memref<8x8xf32, #tpu.memory_space<vmem>>, vector<8x8xf32>
    %cst_9 = arith.constant dense<0.000000e+00> : vector<8x32xf32>
    %7 = tpu.matmul %6, %5, %cst_9 {dimension_numbers = #tpu.dot_dimension_numbers<[1], [0], [0], [1], [0, 0, 1, 1], [], []>} : vector<8x8xf32>, vector<8x32xf32>, vector<8x32xf32> -> vector<8x32xf32>
    %c0_10 = arith.constant 0 : index
    %c2 = arith.constant 2 : index
    %8 = vector.load %arg9[%c0_10, %c2] : memref<8x4xf32, #tpu.memory_space<vmem>>, vector<8x1xf32>
    %9 = vector.broadcast %8 : vector<8x1xf32> to vector<8x32xf32>
    %10 = arith.addf %7, %9 : vector<8x32xf32>
    %11 = arith.negf %10 : vector<8x32xf32>
    %12 = math.exp %11 : vector<8x32xf32>
    %cst_11 = arith.constant 1.000000e+00 : f32
    %13 = vector.broadcast %cst_11 : f32 to vector<8x32xf32>
    %14 = arith.addf %13, %12 : vector<8x32xf32>
    %15 = arith.divf %13, %14 : vector<8x32xf32>
    %16 = vector.extract_strided_slice %15 {offsets = [0, 0], sizes = [8, 16], strides = [1, 1]} : vector<8x32xf32> to vector<8x16xf32>
    %c0_12 = arith.constant 0 : index
    %c0_13 = arith.constant 0 : index
    %17 = vector.load %arg3[%c0_12, %c0_13] : memref<16x256xf32, #tpu.memory_space<vmem>>, vector<16x256xf32>
    %cst_14 = arith.constant dense<0.000000e+00> : vector<8x256xf32>
    %18 = tpu.matmul %16, %17, %cst_14 {dimension_numbers = #tpu.dot_dimension_numbers<[1], [0], [0], [1], [0, 0, 1, 1], [], []>} : vector<8x16xf32>, vector<16x256xf32>, vector<8x256xf32> -> vector<8x256xf32>
    %19 = vector.extract_strided_slice %15 {offsets = [0, 16], sizes = [8, 16], strides = [1, 1]} : vector<8x32xf32> to vector<8x16xf32>
    %c0_15 = arith.constant 0 : index
    %c0_16 = arith.constant 0 : index
    %20 = vector.load %arg4[%c0_15, %c0_16] : memref<16x256xf32, #tpu.memory_space<vmem>>, vector<16x256xf32>
    %cst_17 = arith.constant dense<0.000000e+00> : vector<8x256xf32>
    %21 = tpu.matmul %19, %20, %cst_17 {dimension_numbers = #tpu.dot_dimension_numbers<[1], [0], [0], [1], [0, 0, 1, 1], [], []>} : vector<8x16xf32>, vector<16x256xf32>, vector<8x256xf32> -> vector<8x256xf32>
    %22 = arith.mulf %0, %18 : vector<8x256xf32>
    %23 = arith.mulf %22, %21 : vector<8x256xf32>
    %cst_18 = arith.constant dense<0.000000e+00> : vector<8xf32>
    %24 = vector.multi_reduction <add>, %23, %cst_18 [1] : vector<8x256xf32> to vector<8xf32>
    %25 = vector.shape_cast %24 : vector<8xf32> to vector<8x1xf32>
    %cst_19 = arith.constant 2.560000e+02 : f32
    %26 = vector.broadcast %cst_19 : f32 to vector<8x1xf32>
    %27 = arith.divf %25, %26 : vector<8x1xf32>
    %28 = vector.broadcast %27 : vector<8x1xf32> to vector<8x256xf32>
    %29 = arith.subf %23, %28 : vector<8x256xf32>
    %30 = arith.mulf %29, %29 : vector<8x256xf32>
    %cst_20 = arith.constant dense<0.000000e+00> : vector<8xf32>
    %31 = vector.multi_reduction <add>, %30, %cst_20 [1] : vector<8x256xf32> to vector<8xf32>
    %32 = vector.shape_cast %31 : vector<8xf32> to vector<8x1xf32>
    %cst_21 = arith.constant 2.560000e+02 : f32
    %33 = vector.broadcast %cst_21 : f32 to vector<8x1xf32>
    %34 = arith.divf %32, %33 : vector<8x1xf32>
    %cst_22 = arith.constant 9.99999974E-6 : f32
    %35 = vector.broadcast %cst_22 : f32 to vector<8x1xf32>
    %36 = arith.addf %34, %35 : vector<8x1xf32>
    %37 = math.rsqrt %36 : vector<8x1xf32>
    %38 = vector.broadcast %37 : vector<8x1xf32> to vector<8x256xf32>
    %39 = arith.mulf %29, %38 : vector<8x256xf32>
    %c0_23 = arith.constant 0 : index
    %c0_24 = arith.constant 0 : index
    %40 = vector.load %arg9[%c0_23, %c0_24] : memref<8x4xf32, #tpu.memory_space<vmem>>, vector<8x1xf32>
    %41 = vector.broadcast %40 : vector<8x1xf32> to vector<8x256xf32>
    %42 = arith.mulf %39, %41 : vector<8x256xf32>
    %c0_25 = arith.constant 0 : index
    %c1 = arith.constant 1 : index
    %43 = vector.load %arg9[%c0_25, %c1] : memref<8x4xf32, #tpu.memory_space<vmem>>, vector<8x1xf32>
    %44 = vector.broadcast %43 : vector<8x1xf32> to vector<8x256xf32>
    %45 = arith.addf %42, %44 : vector<8x256xf32>
    %cst_26 = arith.constant 0.000000e+00 : f32
    %46 = vector.broadcast %cst_26 : f32 to vector<8x256xf32>
    %c0_27 = arith.constant 0 : index
    %c79 = arith.constant 79 : index
    %47 = vector.load %arg11[%c0_27, %c79] : memref<8x448xf32, #tpu.memory_space<vmem>>, vector<8x256xf32>
    %c0_28 = arith.constant 0 : index
    %c0_29 = arith.constant 0 : index
    %c0_30 = arith.constant 0 : index
    %48 = vector.load %arg8[%c0_28, %c0_29, %c0_30] : memref<27x1x256xf32, #tpu.memory_space<vmem>>, vector<1x1x256xf32>
    %49 = vector.shape_cast %48 : vector<1x1x256xf32> to vector<1x256xf32>
    %50 = vector.broadcast %49 : vector<1x256xf32> to vector<8x256xf32>
    %51 = arith.mulf %47, %50 : vector<8x256xf32>
    %c0_31 = arith.constant 0 : index
    %c0_32 = arith.constant 0 : index
    %c0_33 = arith.constant 0 : index
    %52 = vector.load %arg6[%c0_31, %c0_32, %c0_33] : memref<27x8x8xf32, #tpu.memory_space<vmem>>, vector<1x8x8xf32>
    %53 = vector.shape_cast %52 : vector<1x8x8xf32> to vector<8x8xf32>
    %cst_34 = arith.constant dense<0.000000e+00> : vector<8x256xf32>
    %54 = tpu.matmul %53, %51, %cst_34 {dimension_numbers = #tpu.dot_dimension_numbers<[1], [0], [0], [1], [0, 0, 1, 1], [], []>} : vector<8x8xf32>, vector<8x256xf32>, vector<8x256xf32> -> vector<8x256xf32>
    %55 = arith.addf %46, %54 : vector<8x256xf32>
    %c0_35 = arith.constant 0 : index
    %c80 = arith.constant 80 : index
    %56 = vector.load %arg11[%c0_35, %c80] : memref<8x448xf32, #tpu.memory_space<vmem>>, vector<8x256xf32>
    %c1_36 = arith.constant 1 : index
    %c0_37 = arith.constant 0 : index
    %c0_38 = arith.constant 0 : index
    %57 = vector.load %arg8[%c1_36, %c0_37, %c0_38] : memref<27x1x256xf32, #tpu.memory_space<vmem>>, vector<1x1x256xf32>
    %58 = vector.shape_cast %57 : vector<1x1x256xf32> to vector<1x256xf32>
    %59 = vector.broadcast %58 : vector<1x256xf32> to vector<8x256xf32>
    %60 = arith.mulf %56, %59 : vector<8x256xf32>
    %c1_39 = arith.constant 1 : index
    %c0_40 = arith.constant 0 : index
    %c0_41 = arith.constant 0 : index
    %61 = vector.load %arg6[%c1_39, %c0_40, %c0_41] : memref<27x8x8xf32, #tpu.memory_space<vmem>>, vector<1x8x8xf32>
    %62 = vector.shape_cast %61 : vector<1x8x8xf32> to vector<8x8xf32>
    %cst_42 = arith.constant dense<0.000000e+00> : vector<8x256xf32>
    %63 = tpu.matmul %62, %60, %cst_42 {dimension_numbers = #tpu.dot_dimension_numbers<[1], [0], [0], [1], [0, 0, 1, 1], [], []>} : vector<8x8xf32>, vector<8x256xf32>, vector<8x256xf32> -> vector<8x256xf32>
    %64 = arith.addf %55, %63 : vector<8x256xf32>
    %c0_43 = arith.constant 0 : index
    %c81 = arith.constant 81 : index
    %65 = vector.load %arg11[%c0_43, %c81] : memref<8x448xf32, #tpu.memory_space<vmem>>, vector<8x256xf32>
    %c2_44 = arith.constant 2 : index
    %c0_45 = arith.constant 0 : index
    %c0_46 = arith.constant 0 : index
    %66 = vector.load %arg8[%c2_44, %c0_45, %c0_46] : memref<27x1x256xf32, #tpu.memory_space<vmem>>, vector<1x1x256xf32>
    %67 = vector.shape_cast %66 : vector<1x1x256xf32> to vector<1x256xf32>
    %68 = vector.broadcast %67 : vector<1x256xf32> to vector<8x256xf32>
    %69 = arith.mulf %65, %68 : vector<8x256xf32>
    %c2_47 = arith.constant 2 : index
    %c0_48 = arith.constant 0 : index
    %c0_49 = arith.constant 0 : index
    %70 = vector.load %arg6[%c2_47, %c0_48, %c0_49] : memref<27x8x8xf32, #tpu.memory_space<vmem>>, vector<1x8x8xf32>
    %71 = vector.shape_cast %70 : vector<1x8x8xf32> to vector<8x8xf32>
    %cst_50 = arith.constant dense<0.000000e+00> : vector<8x256xf32>
    %72 = tpu.matmul %71, %69, %cst_50 {dimension_numbers = #tpu.dot_dimension_numbers<[1], [0], [0], [1], [0, 0, 1, 1], [], []>} : vector<8x8xf32>, vector<8x256xf32>, vector<8x256xf32> -> vector<8x256xf32>
    %73 = arith.addf %64, %72 : vector<8x256xf32>
    %c0_51 = arith.constant 0 : index
    %c95 = arith.constant 95 : index
    %74 = vector.load %arg11[%c0_51, %c95] : memref<8x448xf32, #tpu.memory_space<vmem>>, vector<8x256xf32>
    %c3 = arith.constant 3 : index
    %c0_52 = arith.constant 0 : index
    %c0_53 = arith.constant 0 : index
    %75 = vector.load %arg8[%c3, %c0_52, %c0_53] : memref<27x1x256xf32, #tpu.memory_space<vmem>>, vector<1x1x256xf32>
    %76 = vector.shape_cast %75 : vector<1x1x256xf32> to vector<1x256xf32>
    %77 = vector.broadcast %76 : vector<1x256xf32> to vector<8x256xf32>
    %78 = arith.mulf %74, %77 : vector<8x256xf32>
    %c3_54 = arith.constant 3 : index
    %c0_55 = arith.constant 0 : index
    %c0_56 = arith.constant 0 : index
    %79 = vector.load %arg6[%c3_54, %c0_55, %c0_56] : memref<27x8x8xf32, #tpu.memory_space<vmem>>, vector<1x8x8xf32>
    %80 = vector.shape_cast %79 : vector<1x8x8xf32> to vector<8x8xf32>
    %cst_57 = arith.constant dense<0.000000e+00> : vector<8x256xf32>
    %81 = tpu.matmul %80, %78, %cst_57 {dimension_numbers = #tpu.dot_dimension_numbers<[1], [0], [0], [1], [0, 0, 1, 1], [], []>} : vector<8x8xf32>, vector<8x256xf32>, vector<8x256xf32> -> vector<8x256xf32>
    %82 = arith.addf %73, %81 : vector<8x256xf32>
    %c0_58 = arith.constant 0 : index
    %c96_59 = arith.constant 96 : index
    %83 = vector.load %arg11[%c0_58, %c96_59] : memref<8x448xf32, #tpu.memory_space<vmem>>, vector<8x256xf32>
    %c4 = arith.constant 4 : index
    %c0_60 = arith.constant 0 : index
    %c0_61 = arith.constant 0 : index
    %84 = vector.load %arg8[%c4, %c0_60, %c0_61] : memref<27x1x256xf32, #tpu.memory_space<vmem>>, vector<1x1x256xf32>
    %85 = vector.shape_cast %84 : vector<1x1x256xf32> to vector<1x256xf32>
    %86 = vector.broadcast %85 : vector<1x256xf32> to vector<8x256xf32>
    %87 = arith.mulf %83, %86 : vector<8x256xf32>
    %c4_62 = arith.constant 4 : index
    %c0_63 = arith.constant 0 : index
    %c0_64 = arith.constant 0 : index
    %88 = vector.load %arg6[%c4_62, %c0_63, %c0_64] : memref<27x8x8xf32, #tpu.memory_space<vmem>>, vector<1x8x8xf32>
    %89 = vector.shape_cast %88 : vector<1x8x8xf32> to vector<8x8xf32>
    %cst_65 = arith.constant dense<0.000000e+00> : vector<8x256xf32>
    %90 = tpu.matmul %89, %87, %cst_65 {dimension_numbers = #tpu.dot_dimension_numbers<[1], [0], [0], [1], [0, 0, 1, 1], [], []>} : vector<8x8xf32>, vector<8x256xf32>, vector<8x256xf32> -> vector<8x256xf32>
    %91 = arith.addf %82, %90 : vector<8x256xf32>
    %c0_66 = arith.constant 0 : index
    %c97 = arith.constant 97 : index
    %92 = vector.load %arg11[%c0_66, %c97] : memref<8x448xf32, #tpu.memory_space<vmem>>, vector<8x256xf32>
    %c5 = arith.constant 5 : index
    %c0_67 = arith.constant 0 : index
    %c0_68 = arith.constant 0 : index
    %93 = vector.load %arg8[%c5, %c0_67, %c0_68] : memref<27x1x256xf32, #tpu.memory_space<vmem>>, vector<1x1x256xf32>
    %94 = vector.shape_cast %93 : vector<1x1x256xf32> to vector<1x256xf32>
    %95 = vector.broadcast %94 : vector<1x256xf32> to vector<8x256xf32>
    %96 = arith.mulf %92, %95 : vector<8x256xf32>
    %c5_69 = arith.constant 5 : index
    %c0_70 = arith.constant 0 : index
    %c0_71 = arith.constant 0 : index
    %97 = vector.load %arg6[%c5_69, %c0_70, %c0_71] : memref<27x8x8xf32, #tpu.memory_space<vmem>>, vector<1x8x8xf32>
    %98 = vector.shape_cast %97 : vector<1x8x8xf32> to vector<8x8xf32>
    %cst_72 = arith.constant dense<0.000000e+00> : vector<8x256xf32>
    %99 = tpu.matmul %98, %96, %cst_72 {dimension_numbers = #tpu.dot_dimension_numbers<[1], [0], [0], [1], [0, 0, 1, 1], [], []>} : vector<8x8xf32>, vector<8x256xf32>, vector<8x256xf32> -> vector<8x256xf32>
    %100 = arith.addf %91, %99 : vector<8x256xf32>
    %c0_73 = arith.constant 0 : index
    %c111 = arith.constant 111 : index
    %101 = vector.load %arg11[%c0_73, %c111] : memref<8x448xf32, #tpu.memory_space<vmem>>, vector<8x256xf32>
    %c6 = arith.constant 6 : index
    %c0_74 = arith.constant 0 : index
    %c0_75 = arith.constant 0 : index
    %102 = vector.load %arg8[%c6, %c0_74, %c0_75] : memref<27x1x256xf32, #tpu.memory_space<vmem>>, vector<1x1x256xf32>
    %103 = vector.shape_cast %102 : vector<1x1x256xf32> to vector<1x256xf32>
    %104 = vector.broadcast %103 : vector<1x256xf32> to vector<8x256xf32>
    %105 = arith.mulf %101, %104 : vector<8x256xf32>
    %c6_76 = arith.constant 6 : index
    %c0_77 = arith.constant 0 : index
    %c0_78 = arith.constant 0 : index
    %106 = vector.load %arg6[%c6_76, %c0_77, %c0_78] : memref<27x8x8xf32, #tpu.memory_space<vmem>>, vector<1x8x8xf32>
    %107 = vector.shape_cast %106 : vector<1x8x8xf32> to vector<8x8xf32>
    %cst_79 = arith.constant dense<0.000000e+00> : vector<8x256xf32>
    %108 = tpu.matmul %107, %105, %cst_79 {dimension_numbers = #tpu.dot_dimension_numbers<[1], [0], [0], [1], [0, 0, 1, 1], [], []>} : vector<8x8xf32>, vector<8x256xf32>, vector<8x256xf32> -> vector<8x256xf32>
    %109 = arith.addf %100, %108 : vector<8x256xf32>
    %c0_80 = arith.constant 0 : index
    %c112 = arith.constant 112 : index
    %110 = vector.load %arg11[%c0_80, %c112] : memref<8x448xf32, #tpu.memory_space<vmem>>, vector<8x256xf32>
    %c7 = arith.constant 7 : index
    %c0_81 = arith.constant 0 : index
    %c0_82 = arith.constant 0 : index
    %111 = vector.load %arg8[%c7, %c0_81, %c0_82] : memref<27x1x256xf32, #tpu.memory_space<vmem>>, vector<1x1x256xf32>
    %112 = vector.shape_cast %111 : vector<1x1x256xf32> to vector<1x256xf32>
    %113 = vector.broadcast %112 : vector<1x256xf32> to vector<8x256xf32>
    %114 = arith.mulf %110, %113 : vector<8x256xf32>
    %c7_83 = arith.constant 7 : index
    %c0_84 = arith.constant 0 : index
    %c0_85 = arith.constant 0 : index
    %115 = vector.load %arg6[%c7_83, %c0_84, %c0_85] : memref<27x8x8xf32, #tpu.memory_space<vmem>>, vector<1x8x8xf32>
    %116 = vector.shape_cast %115 : vector<1x8x8xf32> to vector<8x8xf32>
    %cst_86 = arith.constant dense<0.000000e+00> : vector<8x256xf32>
    %117 = tpu.matmul %116, %114, %cst_86 {dimension_numbers = #tpu.dot_dimension_numbers<[1], [0], [0], [1], [0, 0, 1, 1], [], []>} : vector<8x8xf32>, vector<8x256xf32>, vector<8x256xf32> -> vector<8x256xf32>
    %118 = arith.addf %109, %117 : vector<8x256xf32>
    %c0_87 = arith.constant 0 : index
    %c113 = arith.constant 113 : index
    %119 = vector.load %arg11[%c0_87, %c113] : memref<8x448xf32, #tpu.memory_space<vmem>>, vector<8x256xf32>
    %c8 = arith.constant 8 : index
    %c0_88 = arith.constant 0 : index
    %c0_89 = arith.constant 0 : index
    %120 = vector.load %arg8[%c8, %c0_88, %c0_89] : memref<27x1x256xf32, #tpu.memory_space<vmem>>, vector<1x1x256xf32>
    %121 = vector.shape_cast %120 : vector<1x1x256xf32> to vector<1x256xf32>
    %122 = vector.broadcast %121 : vector<1x256xf32> to vector<8x256xf32>
    %123 = arith.mulf %119, %122 : vector<8x256xf32>
    %c8_90 = arith.constant 8 : index
    %c0_91 = arith.constant 0 : index
    %c0_92 = arith.constant 0 : index
    %124 = vector.load %arg6[%c8_90, %c0_91, %c0_92] : memref<27x8x8xf32, #tpu.memory_space<vmem>>, vector<1x8x8xf32>
    %125 = vector.shape_cast %124 : vector<1x8x8xf32> to vector<8x8xf32>
    %cst_93 = arith.constant dense<0.000000e+00> : vector<8x256xf32>
    %126 = tpu.matmul %125, %123, %cst_93 {dimension_numbers = #tpu.dot_dimension_numbers<[1], [0], [0], [1], [0, 0, 1, 1], [], []>} : vector<8x8xf32>, vector<8x256xf32>, vector<8x256xf32> -> vector<8x256xf32>
    %127 = arith.addf %118, %126 : vector<8x256xf32>
    %c0_94 = arith.constant 0 : index
    %c45 = arith.constant 45 : index
    %128 = vector.load %arg11[%c0_94, %c45] : memref<8x448xf32, #tpu.memory_space<vmem>>, vector<8x256xf32>
    %c9 = arith.constant 9 : index
    %c0_95 = arith.constant 0 : index
    %c0_96 = arith.constant 0 : index
    %129 = vector.load %arg8[%c9, %c0_95, %c0_96] : memref<27x1x256xf32, #tpu.memory_space<vmem>>, vector<1x1x256xf32>
    %130 = vector.shape_cast %129 : vector<1x1x256xf32> to vector<1x256xf32>
    %131 = vector.broadcast %130 : vector<1x256xf32> to vector<8x256xf32>
    %132 = arith.mulf %128, %131 : vector<8x256xf32>
    %c9_97 = arith.constant 9 : index
    %c0_98 = arith.constant 0 : index
    %c0_99 = arith.constant 0 : index
    %133 = vector.load %arg6[%c9_97, %c0_98, %c0_99] : memref<27x8x8xf32, #tpu.memory_space<vmem>>, vector<1x8x8xf32>
    %134 = vector.shape_cast %133 : vector<1x8x8xf32> to vector<8x8xf32>
    %cst_100 = arith.constant dense<0.000000e+00> : vector<8x256xf32>
    %135 = tpu.matmul %134, %132, %cst_100 {dimension_numbers = #tpu.dot_dimension_numbers<[1], [0], [0], [1], [0, 0, 1, 1], [], []>} : vector<8x8xf32>, vector<8x256xf32>, vector<8x256xf32> -> vector<8x256xf32>
    %136 = arith.addf %127, %135 : vector<8x256xf32>
    %c0_101 = arith.constant 0 : index
    %c48 = arith.constant 48 : index
    %137 = vector.load %arg11[%c0_101, %c48] : memref<8x448xf32, #tpu.memory_space<vmem>>, vector<8x256xf32>
    %c10 = arith.constant 10 : index
    %c0_102 = arith.constant 0 : index
    %c0_103 = arith.constant 0 : index
    %138 = vector.load %arg8[%c10, %c0_102, %c0_103] : memref<27x1x256xf32, #tpu.memory_space<vmem>>, vector<1x1x256xf32>
    %139 = vector.shape_cast %138 : vector<1x1x256xf32> to vector<1x256xf32>
    %140 = vector.broadcast %139 : vector<1x256xf32> to vector<8x256xf32>
    %141 = arith.mulf %137, %140 : vector<8x256xf32>
    %c10_104 = arith.constant 10 : index
    %c0_105 = arith.constant 0 : index
    %c0_106 = arith.constant 0 : index
    %142 = vector.load %arg6[%c10_104, %c0_105, %c0_106] : memref<27x8x8xf32, #tpu.memory_space<vmem>>, vector<1x8x8xf32>
    %143 = vector.shape_cast %142 : vector<1x8x8xf32> to vector<8x8xf32>
    %cst_107 = arith.constant dense<0.000000e+00> : vector<8x256xf32>
    %144 = tpu.matmul %143, %141, %cst_107 {dimension_numbers = #tpu.dot_dimension_numbers<[1], [0], [0], [1], [0, 0, 1, 1], [], []>} : vector<8x8xf32>, vector<8x256xf32>, vector<8x256xf32> -> vector<8x256xf32>
    %145 = arith.addf %136, %144 : vector<8x256xf32>
    %c0_108 = arith.constant 0 : index
    %c51 = arith.constant 51 : index
    %146 = vector.load %arg11[%c0_108, %c51] : memref<8x448xf32, #tpu.memory_space<vmem>>, vector<8x256xf32>
    %c11 = arith.constant 11 : index
    %c0_109 = arith.constant 0 : index
    %c0_110 = arith.constant 0 : index
    %147 = vector.load %arg8[%c11, %c0_109, %c0_110] : memref<27x1x256xf32, #tpu.memory_space<vmem>>, vector<1x1x256xf32>
    %148 = vector.shape_cast %147 : vector<1x1x256xf32> to vector<1x256xf32>
    %149 = vector.broadcast %148 : vector<1x256xf32> to vector<8x256xf32>
    %150 = arith.mulf %146, %149 : vector<8x256xf32>
    %c11_111 = arith.constant 11 : index
    %c0_112 = arith.constant 0 : index
    %c0_113 = arith.constant 0 : index
    %151 = vector.load %arg6[%c11_111, %c0_112, %c0_113] : memref<27x8x8xf32, #tpu.memory_space<vmem>>, vector<1x8x8xf32>
    %152 = vector.shape_cast %151 : vector<1x8x8xf32> to vector<8x8xf32>
    %cst_114 = arith.constant dense<0.000000e+00> : vector<8x256xf32>
    %153 = tpu.matmul %152, %150, %cst_114 {dimension_numbers = #tpu.dot_dimension_numbers<[1], [0], [0], [1], [0, 0, 1, 1], [], []>} : vector<8x8xf32>, vector<8x256xf32>, vector<8x256xf32> -> vector<8x256xf32>
    %154 = arith.addf %145, %153 : vector<8x256xf32>
    %c0_115 = arith.constant 0 : index
    %c93 = arith.constant 93 : index
    %155 = vector.load %arg11[%c0_115, %c93] : memref<8x448xf32, #tpu.memory_space<vmem>>, vector<8x256xf32>
    %c12 = arith.constant 12 : index
    %c0_116 = arith.constant 0 : index
    %c0_117 = arith.constant 0 : index
    %156 = vector.load %arg8[%c12, %c0_116, %c0_117] : memref<27x1x256xf32, #tpu.memory_space<vmem>>, vector<1x1x256xf32>
    %157 = vector.shape_cast %156 : vector<1x1x256xf32> to vector<1x256xf32>
    %158 = vector.broadcast %157 : vector<1x256xf32> to vector<8x256xf32>
    %159 = arith.mulf %155, %158 : vector<8x256xf32>
    %c12_118 = arith.constant 12 : index
    %c0_119 = arith.constant 0 : index
    %c0_120 = arith.constant 0 : index
    %160 = vector.load %arg6[%c12_118, %c0_119, %c0_120] : memref<27x8x8xf32, #tpu.memory_space<vmem>>, vector<1x8x8xf32>
    %161 = vector.shape_cast %160 : vector<1x8x8xf32> to vector<8x8xf32>
    %cst_121 = arith.constant dense<0.000000e+00> : vector<8x256xf32>
    %162 = tpu.matmul %161, %159, %cst_121 {dimension_numbers = #tpu.dot_dimension_numbers<[1], [0], [0], [1], [0, 0, 1, 1], [], []>} : vector<8x8xf32>, vector<8x256xf32>, vector<8x256xf32> -> vector<8x256xf32>
    %163 = arith.addf %154, %162 : vector<8x256xf32>
    %c0_122 = arith.constant 0 : index
    %c96_123 = arith.constant 96 : index
    %164 = vector.load %arg11[%c0_122, %c96_123] : memref<8x448xf32, #tpu.memory_space<vmem>>, vector<8x256xf32>
    %c13 = arith.constant 13 : index
    %c0_124 = arith.constant 0 : index
    %c0_125 = arith.constant 0 : index
    %165 = vector.load %arg8[%c13, %c0_124, %c0_125] : memref<27x1x256xf32, #tpu.memory_space<vmem>>, vector<1x1x256xf32>
    %166 = vector.shape_cast %165 : vector<1x1x256xf32> to vector<1x256xf32>
    %167 = vector.broadcast %166 : vector<1x256xf32> to vector<8x256xf32>
    %168 = arith.mulf %164, %167 : vector<8x256xf32>
    %c13_126 = arith.constant 13 : index
    %c0_127 = arith.constant 0 : index
    %c0_128 = arith.constant 0 : index
    %169 = vector.load %arg6[%c13_126, %c0_127, %c0_128] : memref<27x8x8xf32, #tpu.memory_space<vmem>>, vector<1x8x8xf32>
    %170 = vector.shape_cast %169 : vector<1x8x8xf32> to vector<8x8xf32>
    %cst_129 = arith.constant dense<0.000000e+00> : vector<8x256xf32>
    %171 = tpu.matmul %170, %168, %cst_129 {dimension_numbers = #tpu.dot_dimension_numbers<[1], [0], [0], [1], [0, 0, 1, 1], [], []>} : vector<8x8xf32>, vector<8x256xf32>, vector<8x256xf32> -> vector<8x256xf32>
    %172 = arith.addf %163, %171 : vector<8x256xf32>
    %c0_130 = arith.constant 0 : index
    %c99 = arith.constant 99 : index
    %173 = vector.load %arg11[%c0_130, %c99] : memref<8x448xf32, #tpu.memory_space<vmem>>, vector<8x256xf32>
    %c14 = arith.constant 14 : index
    %c0_131 = arith.constant 0 : index
    %c0_132 = arith.constant 0 : index
    %174 = vector.load %arg8[%c14, %c0_131, %c0_132] : memref<27x1x256xf32, #tpu.memory_space<vmem>>, vector<1x1x256xf32>
    %175 = vector.shape_cast %174 : vector<1x1x256xf32> to vector<1x256xf32>
    %176 = vector.broadcast %175 : vector<1x256xf32> to vector<8x256xf32>
    %177 = arith.mulf %173, %176 : vector<8x256xf32>
    %c14_133 = arith.constant 14 : index
    %c0_134 = arith.constant 0 : index
    %c0_135 = arith.constant 0 : index
    %178 = vector.load %arg6[%c14_133, %c0_134, %c0_135] : memref<27x8x8xf32, #tpu.memory_space<vmem>>, vector<1x8x8xf32>
    %179 = vector.shape_cast %178 : vector<1x8x8xf32> to vector<8x8xf32>
    %cst_136 = arith.constant dense<0.000000e+00> : vector<8x256xf32>
    %180 = tpu.matmul %179, %177, %cst_136 {dimension_numbers = #tpu.dot_dimension_numbers<[1], [0], [0], [1], [0, 0, 1, 1], [], []>} : vector<8x8xf32>, vector<8x256xf32>, vector<8x256xf32> -> vector<8x256xf32>
    %181 = arith.addf %172, %180 : vector<8x256xf32>
    %c0_137 = arith.constant 0 : index
    %c141 = arith.constant 141 : index
    %182 = vector.load %arg11[%c0_137, %c141] : memref<8x448xf32, #tpu.memory_space<vmem>>, vector<8x256xf32>
    %c15 = arith.constant 15 : index
    %c0_138 = arith.constant 0 : index
    %c0_139 = arith.constant 0 : index
    %183 = vector.load %arg8[%c15, %c0_138, %c0_139] : memref<27x1x256xf32, #tpu.memory_space<vmem>>, vector<1x1x256xf32>
    %184 = vector.shape_cast %183 : vector<1x1x256xf32> to vector<1x256xf32>
    %185 = vector.broadcast %184 : vector<1x256xf32> to vector<8x256xf32>
    %186 = arith.mulf %182, %185 : vector<8x256xf32>
    %c15_140 = arith.constant 15 : index
    %c0_141 = arith.constant 0 : index
    %c0_142 = arith.constant 0 : index
    %187 = vector.load %arg6[%c15_140, %c0_141, %c0_142] : memref<27x8x8xf32, #tpu.memory_space<vmem>>, vector<1x8x8xf32>
    %188 = vector.shape_cast %187 : vector<1x8x8xf32> to vector<8x8xf32>
    %cst_143 = arith.constant dense<0.000000e+00> : vector<8x256xf32>
    %189 = tpu.matmul %188, %186, %cst_143 {dimension_numbers = #tpu.dot_dimension_numbers<[1], [0], [0], [1], [0, 0, 1, 1], [], []>} : vector<8x8xf32>, vector<8x256xf32>, vector<8x256xf32> -> vector<8x256xf32>
    %190 = arith.addf %181, %189 : vector<8x256xf32>
    %c0_144 = arith.constant 0 : index
    %c144 = arith.constant 144 : index
    %191 = vector.load %arg11[%c0_144, %c144] : memref<8x448xf32, #tpu.memory_space<vmem>>, vector<8x256xf32>
    %c16 = arith.constant 16 : index
    %c0_145 = arith.constant 0 : index
    %c0_146 = arith.constant 0 : index
    %192 = vector.load %arg8[%c16, %c0_145, %c0_146] : memref<27x1x256xf32, #tpu.memory_space<vmem>>, vector<1x1x256xf32>
    %193 = vector.shape_cast %192 : vector<1x1x256xf32> to vector<1x256xf32>
    %194 = vector.broadcast %193 : vector<1x256xf32> to vector<8x256xf32>
    %195 = arith.mulf %191, %194 : vector<8x256xf32>
    %c16_147 = arith.constant 16 : index
    %c0_148 = arith.constant 0 : index
    %c0_149 = arith.constant 0 : index
    %196 = vector.load %arg6[%c16_147, %c0_148, %c0_149] : memref<27x8x8xf32, #tpu.memory_space<vmem>>, vector<1x8x8xf32>
    %197 = vector.shape_cast %196 : vector<1x8x8xf32> to vector<8x8xf32>
    %cst_150 = arith.constant dense<0.000000e+00> : vector<8x256xf32>
    %198 = tpu.matmul %197, %195, %cst_150 {dimension_numbers = #tpu.dot_dimension_numbers<[1], [0], [0], [1], [0, 0, 1, 1], [], []>} : vector<8x8xf32>, vector<8x256xf32>, vector<8x256xf32> -> vector<8x256xf32>
    %199 = arith.addf %190, %198 : vector<8x256xf32>
    %c0_151 = arith.constant 0 : index
    %c147 = arith.constant 147 : index
    %200 = vector.load %arg11[%c0_151, %c147] : memref<8x448xf32, #tpu.memory_space<vmem>>, vector<8x256xf32>
    %c17 = arith.constant 17 : index
    %c0_152 = arith.constant 0 : index
    %c0_153 = arith.constant 0 : index
    %201 = vector.load %arg8[%c17, %c0_152, %c0_153] : memref<27x1x256xf32, #tpu.memory_space<vmem>>, vector<1x1x256xf32>
    %202 = vector.shape_cast %201 : vector<1x1x256xf32> to vector<1x256xf32>
    %203 = vector.broadcast %202 : vector<1x256xf32> to vector<8x256xf32>
    %204 = arith.mulf %200, %203 : vector<8x256xf32>
    %c17_154 = arith.constant 17 : index
    %c0_155 = arith.constant 0 : index
    %c0_156 = arith.constant 0 : index
    %205 = vector.load %arg6[%c17_154, %c0_155, %c0_156] : memref<27x8x8xf32, #tpu.memory_space<vmem>>, vector<1x8x8xf32>
    %206 = vector.shape_cast %205 : vector<1x8x8xf32> to vector<8x8xf32>
    %cst_157 = arith.constant dense<0.000000e+00> : vector<8x256xf32>
    %207 = tpu.matmul %206, %204, %cst_157 {dimension_numbers = #tpu.dot_dimension_numbers<[1], [0], [0], [1], [0, 0, 1, 1], [], []>} : vector<8x8xf32>, vector<8x256xf32>, vector<8x256xf32> -> vector<8x256xf32>
    %208 = arith.addf %199, %207 : vector<8x256xf32>
    %c0_158 = arith.constant 0 : index
    %c11_159 = arith.constant 11 : index
    %209 = vector.load %arg11[%c0_158, %c11_159] : memref<8x448xf32, #tpu.memory_space<vmem>>, vector<8x256xf32>
    %c18 = arith.constant 18 : index
    %c0_160 = arith.constant 0 : index
    %c0_161 = arith.constant 0 : index
    %210 = vector.load %arg8[%c18, %c0_160, %c0_161] : memref<27x1x256xf32, #tpu.memory_space<vmem>>, vector<1x1x256xf32>
    %211 = vector.shape_cast %210 : vector<1x1x256xf32> to vector<1x256xf32>
    %212 = vector.broadcast %211 : vector<1x256xf32> to vector<8x256xf32>
    %213 = arith.mulf %209, %212 : vector<8x256xf32>
    %c18_162 = arith.constant 18 : index
    %c0_163 = arith.constant 0 : index
    %c0_164 = arith.constant 0 : index
    %214 = vector.load %arg6[%c18_162, %c0_163, %c0_164] : memref<27x8x8xf32, #tpu.memory_space<vmem>>, vector<1x8x8xf32>
    %215 = vector.shape_cast %214 : vector<1x8x8xf32> to vector<8x8xf32>
    %cst_165 = arith.constant dense<0.000000e+00> : vector<8x256xf32>
    %216 = tpu.matmul %215, %213, %cst_165 {dimension_numbers = #tpu.dot_dimension_numbers<[1], [0], [0], [1], [0, 0, 1, 1], [], []>} : vector<8x8xf32>, vector<8x256xf32>, vector<8x256xf32> -> vector<8x256xf32>
    %217 = arith.addf %208, %216 : vector<8x256xf32>
    %c0_166 = arith.constant 0 : index
    %c16_167 = arith.constant 16 : index
    %218 = vector.load %arg11[%c0_166, %c16_167] : memref<8x448xf32, #tpu.memory_space<vmem>>, vector<8x256xf32>
    %c19 = arith.constant 19 : index
    %c0_168 = arith.constant 0 : index
    %c0_169 = arith.constant 0 : index
    %219 = vector.load %arg8[%c19, %c0_168, %c0_169] : memref<27x1x256xf32, #tpu.memory_space<vmem>>, vector<1x1x256xf32>
    %220 = vector.shape_cast %219 : vector<1x1x256xf32> to vector<1x256xf32>
    %221 = vector.broadcast %220 : vector<1x256xf32> to vector<8x256xf32>
    %222 = arith.mulf %218, %221 : vector<8x256xf32>
    %c19_170 = arith.constant 19 : index
    %c0_171 = arith.constant 0 : index
    %c0_172 = arith.constant 0 : index
    %223 = vector.load %arg6[%c19_170, %c0_171, %c0_172] : memref<27x8x8xf32, #tpu.memory_space<vmem>>, vector<1x8x8xf32>
    %224 = vector.shape_cast %223 : vector<1x8x8xf32> to vector<8x8xf32>
    %cst_173 = arith.constant dense<0.000000e+00> : vector<8x256xf32>
    %225 = tpu.matmul %224, %222, %cst_173 {dimension_numbers = #tpu.dot_dimension_numbers<[1], [0], [0], [1], [0, 0, 1, 1], [], []>} : vector<8x8xf32>, vector<8x256xf32>, vector<8x256xf32> -> vector<8x256xf32>
    %226 = arith.addf %217, %225 : vector<8x256xf32>
    %c0_174 = arith.constant 0 : index
    %c21 = arith.constant 21 : index
    %227 = vector.load %arg11[%c0_174, %c21] : memref<8x448xf32, #tpu.memory_space<vmem>>, vector<8x256xf32>
    %c20 = arith.constant 20 : index
    %c0_175 = arith.constant 0 : index
    %c0_176 = arith.constant 0 : index
    %228 = vector.load %arg8[%c20, %c0_175, %c0_176] : memref<27x1x256xf32, #tpu.memory_space<vmem>>, vector<1x1x256xf32>
    %229 = vector.shape_cast %228 : vector<1x1x256xf32> to vector<1x256xf32>
    %230 = vector.broadcast %229 : vector<1x256xf32> to vector<8x256xf32>
    %231 = arith.mulf %227, %230 : vector<8x256xf32>
    %c20_177 = arith.constant 20 : index
    %c0_178 = arith.constant 0 : index
    %c0_179 = arith.constant 0 : index
    %232 = vector.load %arg6[%c20_177, %c0_178, %c0_179] : memref<27x8x8xf32, #tpu.memory_space<vmem>>, vector<1x8x8xf32>
    %233 = vector.shape_cast %232 : vector<1x8x8xf32> to vector<8x8xf32>
    %cst_180 = arith.constant dense<0.000000e+00> : vector<8x256xf32>
    %234 = tpu.matmul %233, %231, %cst_180 {dimension_numbers = #tpu.dot_dimension_numbers<[1], [0], [0], [1], [0, 0, 1, 1], [], []>} : vector<8x8xf32>, vector<8x256xf32>, vector<8x256xf32> -> vector<8x256xf32>
    %235 = arith.addf %226, %234 : vector<8x256xf32>
    %c0_181 = arith.constant 0 : index
    %c91 = arith.constant 91 : index
    %236 = vector.load %arg11[%c0_181, %c91] : memref<8x448xf32, #tpu.memory_space<vmem>>, vector<8x256xf32>
    %c21_182 = arith.constant 21 : index
    %c0_183 = arith.constant 0 : index
    %c0_184 = arith.constant 0 : index
    %237 = vector.load %arg8[%c21_182, %c0_183, %c0_184] : memref<27x1x256xf32, #tpu.memory_space<vmem>>, vector<1x1x256xf32>
    %238 = vector.shape_cast %237 : vector<1x1x256xf32> to vector<1x256xf32>
    %239 = vector.broadcast %238 : vector<1x256xf32> to vector<8x256xf32>
    %240 = arith.mulf %236, %239 : vector<8x256xf32>
    %c21_185 = arith.constant 21 : index
    %c0_186 = arith.constant 0 : index
    %c0_187 = arith.constant 0 : index
    %241 = vector.load %arg6[%c21_185, %c0_186, %c0_187] : memref<27x8x8xf32, #tpu.memory_space<vmem>>, vector<1x8x8xf32>
    %242 = vector.shape_cast %241 : vector<1x8x8xf32> to vector<8x8xf32>
    %cst_188 = arith.constant dense<0.000000e+00> : vector<8x256xf32>
    %243 = tpu.matmul %242, %240, %cst_188 {dimension_numbers = #tpu.dot_dimension_numbers<[1], [0], [0], [1], [0, 0, 1, 1], [], []>} : vector<8x8xf32>, vector<8x256xf32>, vector<8x256xf32> -> vector<8x256xf32>
    %244 = arith.addf %235, %243 : vector<8x256xf32>
    %c0_189 = arith.constant 0 : index
    %c96_190 = arith.constant 96 : index
    %245 = vector.load %arg11[%c0_189, %c96_190] : memref<8x448xf32, #tpu.memory_space<vmem>>, vector<8x256xf32>
    %c22 = arith.constant 22 : index
    %c0_191 = arith.constant 0 : index
    %c0_192 = arith.constant 0 : index
    %246 = vector.load %arg8[%c22, %c0_191, %c0_192] : memref<27x1x256xf32, #tpu.memory_space<vmem>>, vector<1x1x256xf32>
    %247 = vector.shape_cast %246 : vector<1x1x256xf32> to vector<1x256xf32>
    %248 = vector.broadcast %247 : vector<1x256xf32> to vector<8x256xf32>
    %249 = arith.mulf %245, %248 : vector<8x256xf32>
    %c22_193 = arith.constant 22 : index
    %c0_194 = arith.constant 0 : index
    %c0_195 = arith.constant 0 : index
    %250 = vector.load %arg6[%c22_193, %c0_194, %c0_195] : memref<27x8x8xf32, #tpu.memory_space<vmem>>, vector<1x8x8xf32>
    %251 = vector.shape_cast %250 : vector<1x8x8xf32> to vector<8x8xf32>
    %cst_196 = arith.constant dense<0.000000e+00> : vector<8x256xf32>
    %252 = tpu.matmul %251, %249, %cst_196 {dimension_numbers = #tpu.dot_dimension_numbers<[1], [0], [0], [1], [0, 0, 1, 1], [], []>} : vector<8x8xf32>, vector<8x256xf32>, vector<8x256xf32> -> vector<8x256xf32>
    %253 = arith.addf %244, %252 : vector<8x256xf32>
    %c0_197 = arith.constant 0 : index
    %c101 = arith.constant 101 : index
    %254 = vector.load %arg11[%c0_197, %c101] : memref<8x448xf32, #tpu.memory_space<vmem>>, vector<8x256xf32>
    %c23 = arith.constant 23 : index
    %c0_198 = arith.constant 0 : index
    %c0_199 = arith.constant 0 : index
    %255 = vector.load %arg8[%c23, %c0_198, %c0_199] : memref<27x1x256xf32, #tpu.memory_space<vmem>>, vector<1x1x256xf32>
    %256 = vector.shape_cast %255 : vector<1x1x256xf32> to vector<1x256xf32>
    %257 = vector.broadcast %256 : vector<1x256xf32> to vector<8x256xf32>
    %258 = arith.mulf %254, %257 : vector<8x256xf32>
    %c23_200 = arith.constant 23 : index
    %c0_201 = arith.constant 0 : index
    %c0_202 = arith.constant 0 : index
    %259 = vector.load %arg6[%c23_200, %c0_201, %c0_202] : memref<27x8x8xf32, #tpu.memory_space<vmem>>, vector<1x8x8xf32>
    %260 = vector.shape_cast %259 : vector<1x8x8xf32> to vector<8x8xf32>
    %cst_203 = arith.constant dense<0.000000e+00> : vector<8x256xf32>
    %261 = tpu.matmul %260, %258, %cst_203 {dimension_numbers = #tpu.dot_dimension_numbers<[1], [0], [0], [1], [0, 0, 1, 1], [], []>} : vector<8x8xf32>, vector<8x256xf32>, vector<8x256xf32> -> vector<8x256xf32>
    %262 = arith.addf %253, %261 : vector<8x256xf32>
    %c0_204 = arith.constant 0 : index
    %c171 = arith.constant 171 : index
    %263 = vector.load %arg11[%c0_204, %c171] : memref<8x448xf32, #tpu.memory_space<vmem>>, vector<8x256xf32>
    %c24 = arith.constant 24 : index
    %c0_205 = arith.constant 0 : index
    %c0_206 = arith.constant 0 : index
    %264 = vector.load %arg8[%c24, %c0_205, %c0_206] : memref<27x1x256xf32, #tpu.memory_space<vmem>>, vector<1x1x256xf32>
    %265 = vector.shape_cast %264 : vector<1x1x256xf32> to vector<1x256xf32>
    %266 = vector.broadcast %265 : vector<1x256xf32> to vector<8x256xf32>
    %267 = arith.mulf %263, %266 : vector<8x256xf32>
    %c24_207 = arith.constant 24 : index
    %c0_208 = arith.constant 0 : index
    %c0_209 = arith.constant 0 : index
    %268 = vector.load %arg6[%c24_207, %c0_208, %c0_209] : memref<27x8x8xf32, #tpu.memory_space<vmem>>, vector<1x8x8xf32>
    %269 = vector.shape_cast %268 : vector<1x8x8xf32> to vector<8x8xf32>
    %cst_210 = arith.constant dense<0.000000e+00> : vector<8x256xf32>
    %270 = tpu.matmul %269, %267, %cst_210 {dimension_numbers = #tpu.dot_dimension_numbers<[1], [0], [0], [1], [0, 0, 1, 1], [], []>} : vector<8x8xf32>, vector<8x256xf32>, vector<8x256xf32> -> vector<8x256xf32>
    %271 = arith.addf %262, %270 : vector<8x256xf32>
    %c0_211 = arith.constant 0 : index
    %c176 = arith.constant 176 : index
    %272 = vector.load %arg11[%c0_211, %c176] : memref<8x448xf32, #tpu.memory_space<vmem>>, vector<8x256xf32>
    %c25 = arith.constant 25 : index
    %c0_212 = arith.constant 0 : index
    %c0_213 = arith.constant 0 : index
    %273 = vector.load %arg8[%c25, %c0_212, %c0_213] : memref<27x1x256xf32, #tpu.memory_space<vmem>>, vector<1x1x256xf32>
    %274 = vector.shape_cast %273 : vector<1x1x256xf32> to vector<1x256xf32>
    %275 = vector.broadcast %274 : vector<1x256xf32> to vector<8x256xf32>
    %276 = arith.mulf %272, %275 : vector<8x256xf32>
    %c25_214 = arith.constant 25 : index
    %c0_215 = arith.constant 0 : index
    %c0_216 = arith.constant 0 : index
    %277 = vector.load %arg6[%c25_214, %c0_215, %c0_216] : memref<27x8x8xf32, #tpu.memory_space<vmem>>, vector<1x8x8xf32>
    %278 = vector.shape_cast %277 : vector<1x8x8xf32> to vector<8x8xf32>
    %cst_217 = arith.constant dense<0.000000e+00> : vector<8x256xf32>
    %279 = tpu.matmul %278, %276, %cst_217 {dimension_numbers = #tpu.dot_dimension_numbers<[1], [0], [0], [1], [0, 0, 1, 1], [], []>} : vector<8x8xf32>, vector<8x256xf32>, vector<8x256xf32> -> vector<8x256xf32>
    %280 = arith.addf %271, %279 : vector<8x256xf32>
    %c0_218 = arith.constant 0 : index
    %c181 = arith.constant 181 : index
    %281 = vector.load %arg11[%c0_218, %c181] : memref<8x448xf32, #tpu.memory_space<vmem>>, vector<8x256xf32>
    %c26 = arith.constant 26 : index
    %c0_219 = arith.constant 0 : index
    %c0_220 = arith.constant 0 : index
    %282 = vector.load %arg8[%c26, %c0_219, %c0_220] : memref<27x1x256xf32, #tpu.memory_space<vmem>>, vector<1x1x256xf32>
    %283 = vector.shape_cast %282 : vector<1x1x256xf32> to vector<1x256xf32>
    %284 = vector.broadcast %283 : vector<1x256xf32> to vector<8x256xf32>
    %285 = arith.mulf %281, %284 : vector<8x256xf32>
    %c26_221 = arith.constant 26 : index
    %c0_222 = arith.constant 0 : index
    %c0_223 = arith.constant 0 : index
    %286 = vector.load %arg6[%c26_221, %c0_222, %c0_223] : memref<27x8x8xf32, #tpu.memory_space<vmem>>, vector<1x8x8xf32>
    %287 = vector.shape_cast %286 : vector<1x8x8xf32> to vector<8x8xf32>
    %cst_224 = arith.constant dense<0.000000e+00> : vector<8x256xf32>
    %288 = tpu.matmul %287, %285, %cst_224 {dimension_numbers = #tpu.dot_dimension_numbers<[1], [0], [0], [1], [0, 0, 1, 1], [], []>} : vector<8x8xf32>, vector<8x256xf32>, vector<8x256xf32> -> vector<8x256xf32>
    %289 = arith.addf %280, %288 : vector<8x256xf32>
    %c0_225 = arith.constant 0 : index
    %c3_226 = arith.constant 3 : index
    %290 = vector.load %arg9[%c0_225, %c3_226] : memref<8x4xf32, #tpu.memory_space<vmem>>, vector<8x1xf32>
    %291 = vector.broadcast %290 : vector<8x1xf32> to vector<8x256xf32>
    %292 = arith.addf %289, %291 : vector<8x256xf32>
    %cst_227 = arith.constant dense<0.000000e+00> : vector<8xf32>
    %293 = vector.multi_reduction <add>, %45, %cst_227 [1] : vector<8x256xf32> to vector<8xf32>
    %294 = vector.shape_cast %293 : vector<8xf32> to vector<8x1xf32>
    %cst_228 = arith.constant 2.560000e+02 : f32
    %295 = vector.broadcast %cst_228 : f32 to vector<8x1xf32>
    %296 = arith.divf %294, %295 : vector<8x1xf32>
    %cst_229 = arith.constant dense<0.000000e+00> : vector<8xf32>
    %297 = vector.multi_reduction <add>, %292, %cst_229 [1] : vector<8x256xf32> to vector<8xf32>
    %298 = vector.shape_cast %297 : vector<8xf32> to vector<8x1xf32>
    %cst_230 = arith.constant 2.560000e+02 : f32
    %299 = vector.broadcast %cst_230 : f32 to vector<8x1xf32>
    %300 = arith.divf %298, %299 : vector<8x1xf32>
    %cst_231 = arith.constant dense<0xFF800000> : vector<1xf32>
    %301 = vector.multi_reduction <maximumf>, %296, %cst_231 [0] : vector<8x1xf32> to vector<1xf32>
    %302 = vector.shape_cast %301 : vector<1xf32> to vector<1x1xf32>
    %cst_232 = arith.constant dense<0xFF800000> : vector<1xf32>
    %303 = vector.multi_reduction <maximumf>, %300, %cst_232 [0] : vector<8x1xf32> to vector<1xf32>
    %304 = vector.shape_cast %303 : vector<1xf32> to vector<1x1xf32>
    %305 = arith.maximumf %302, %304 : vector<1x1xf32>
    %306 = vector.broadcast %305 : vector<1x1xf32> to vector<8x1xf32>
    %307 = arith.subf %296, %306 : vector<8x1xf32>
    %308 = math.exp %307 : vector<8x1xf32>
    %309 = vector.broadcast %305 : vector<1x1xf32> to vector<8x1xf32>
    %310 = arith.subf %300, %309 : vector<8x1xf32>
    %311 = math.exp %310 : vector<8x1xf32>
    %cst_233 = arith.constant 1.000000e+00 : f32
    %312 = vector.broadcast %cst_233 : f32 to vector<1x256xf32>
    %c0_234 = arith.constant 0 : index
    %c0_235 = arith.constant 0 : index
    %313 = vector.load %arg7[%c0_234, %c0_235] : memref<8x8xf32, #tpu.memory_space<vmem>>, vector<8x8xf32>
    %314 = vector.broadcast %308 : vector<8x1xf32> to vector<8x256xf32>
    %315 = arith.mulf %314, %292 : vector<8x256xf32>
    %cst_236 = arith.constant dense<0.000000e+00> : vector<8x256xf32>
    %316 = tpu.matmul %313, %315, %cst_236 {dimension_numbers = #tpu.dot_dimension_numbers<[1], [0], [0], [1], [0, 0, 1, 1], [], []>} : vector<8x8xf32>, vector<8x256xf32>, vector<8x256xf32> -> vector<8x256xf32>
    %317 = vector.broadcast %311 : vector<8x1xf32> to vector<8x256xf32>
    %318 = arith.mulf %317, %45 : vector<8x256xf32>
    %cst_237 = arith.constant dense<0.000000e+00> : vector<8x256xf32>
    %319 = tpu.matmul %313, %318, %cst_237 {dimension_numbers = #tpu.dot_dimension_numbers<[1], [0], [0], [1], [0, 0, 1, 1], [], []>} : vector<8x8xf32>, vector<8x256xf32>, vector<8x256xf32> -> vector<8x256xf32>
    %320 = vector.broadcast %308 : vector<8x1xf32> to vector<8x256xf32>
    %321 = vector.broadcast %312 : vector<1x256xf32> to vector<8x256xf32>
    %322 = arith.mulf %320, %321 : vector<8x256xf32>
    %cst_238 = arith.constant dense<0.000000e+00> : vector<8x256xf32>
    %323 = tpu.matmul %313, %322, %cst_238 {dimension_numbers = #tpu.dot_dimension_numbers<[1], [0], [0], [1], [0, 0, 1, 1], [], []>} : vector<8x8xf32>, vector<8x256xf32>, vector<8x256xf32> -> vector<8x256xf32>
    %324 = vector.broadcast %311 : vector<8x1xf32> to vector<8x256xf32>
    %325 = vector.broadcast %312 : vector<1x256xf32> to vector<8x256xf32>
    %326 = arith.mulf %324, %325 : vector<8x256xf32>
    %cst_239 = arith.constant dense<0.000000e+00> : vector<8x256xf32>
    %327 = tpu.matmul %313, %326, %cst_239 {dimension_numbers = #tpu.dot_dimension_numbers<[1], [0], [0], [1], [0, 0, 1, 1], [], []>} : vector<8x8xf32>, vector<8x256xf32>, vector<8x256xf32> -> vector<8x256xf32>
    %328 = tpu.reciprocal %323 : vector<8x256xf32> -> vector<8x256xf32>
    %329 = arith.mulf %316, %328 : vector<8x256xf32>
    %330 = tpu.reciprocal %327 : vector<8x256xf32> -> vector<8x256xf32>
    %331 = arith.mulf %319, %330 : vector<8x256xf32>
    %332 = arith.addf %329, %331 : vector<8x256xf32>
    %333 = arith.negf %332 : vector<8x256xf32>
    %334 = math.exp %333 : vector<8x256xf32>
    %cst_240 = arith.constant 1.000000e+00 : f32
    %335 = vector.broadcast %cst_240 : f32 to vector<8x256xf32>
    %336 = arith.addf %335, %334 : vector<8x256xf32>
    %337 = arith.divf %335, %336 : vector<8x256xf32>
    %338 = arith.mulf %0, %337 : vector<8x256xf32>
    %c0_241 = arith.constant 0 : index
    %c0_242 = arith.constant 0 : index
    %339 = vector.load %arg10[%c0_241, %c0_242] : memref<8x256xf32, #tpu.memory_space<vmem>>, vector<8x256xf32>
    tpu.vector_store %arg10[%c0_241, %c0_242], %338 {strides = array<i32>} : memref<8x256xf32, #tpu.memory_space<vmem>>, vector<8x256xf32>,
    return
  }
  func.func @transform_0(%arg0: i32) -> (i32, i32) {
    %c0_i32 = arith.constant 0 : i32
    %c0_i32_0 = arith.constant 0 : i32
    return %arg0, %c0_i32 : i32, i32
  }
  func.func @transform_1(%arg0: i32) -> (i32, i32) {
    %c0_i32 = arith.constant 0 : i32
    %c0_i32_0 = arith.constant 0 : i32
    %c0_i32_1 = arith.constant 0 : i32
    return %c0_i32, %c0_i32_0 : i32, i32
  }
  func.func @transform_2(%arg0: i32) -> (i32, i32) {
    %c0_i32 = arith.constant 0 : i32
    %c0_i32_0 = arith.constant 0 : i32
    %c0_i32_1 = arith.constant 0 : i32
    return %c0_i32, %c0_i32_0 : i32, i32
  }
  func.func @transform_3(%arg0: i32) -> (i32, i32) {
    %c0_i32 = arith.constant 0 : i32
    %c0_i32_0 = arith.constant 0 : i32
    %c0_i32_1 = arith.constant 0 : i32
    return %c0_i32, %c0_i32_0 : i32, i32
  }
  func.func @transform_4(%arg0: i32) -> (i32, i32) {
    %c0_i32 = arith.constant 0 : i32
    %c0_i32_0 = arith.constant 0 : i32
    %c0_i32_1 = arith.constant 0 : i32
    return %c0_i32, %c0_i32_0 : i32, i32
  }
  func.func @transform_5(%arg0: i32) -> (i32, i32, i32) {
    %c0_i32 = arith.constant 0 : i32
    %c0_i32_0 = arith.constant 0 : i32
    %c0_i32_1 = arith.constant 0 : i32
    %c0_i32_2 = arith.constant 0 : i32
    return %c0_i32, %c0_i32_0, %c0_i32_1 : i32, i32, i32
  }
  func.func @transform_6(%arg0: i32) -> (i32, i32) {
    %c0_i32 = arith.constant 0 : i32
    %c0_i32_0 = arith.constant 0 : i32
    %c0_i32_1 = arith.constant 0 : i32
    return %c0_i32, %c0_i32_0 : i32, i32
  }
  func.func @transform_7(%arg0: i32) -> (i32, i32, i32) {
    %c0_i32 = arith.constant 0 : i32
    %c0_i32_0 = arith.constant 0 : i32
    %c0_i32_1 = arith.constant 0 : i32
    %c0_i32_2 = arith.constant 0 : i32
    return %c0_i32, %c0_i32_0, %c0_i32_1 : i32, i32, i32
  }
  func.func @transform_8(%arg0: i32) -> (i32, i32) {
    %c0_i32 = arith.constant 0 : i32
    %c0_i32_0 = arith.constant 0 : i32
    %c0_i32_1 = arith.constant 0 : i32
    return %c0_i32, %c0_i32_0 : i32, i32
  }
  func.func @transform_9(%arg0: i32) -> (i32, i32) {
    %c0_i32 = arith.constant 0 : i32
    %c0_i32_0 = arith.constant 0 : i32
    return %arg0, %c0_i32 : i32, i32
  }
}

</mosaic_0001>

<bundles_post_ra>
// kernel: tpu_custom_call.1
= control target key start
LH: loop header
LB: loop body
LE: loop exit
PB: predicated region body
PF: predicated region fallthrough
CT: control target
= control target key end

     0   :  { %14 = vsyncpa [#allocation4], 0  ;;  %s5717_s0 = inlined_call_operand.vmem [shape: f32[16,256], index: 0, kind: input, shape index: {}]   ;;  %s5718_s1 = inlined_call_operand.vmem [shape: f32[256,32], index: 1, kind: input, shape index: {}]   ;;  %s5719_s2 = inlined_call_operand.vmem [shape: f32[16,256], index: 2, kind: input, shape index: {}]   ;;  %s5720_s3 = inlined_call_operand.vmem [shape: f32[16,256], index: 3, kind: input, shape index: {}]   ;;  %s5721_s4 = inlined_call_operand.vmem [shape: f32[8,8], index: 4, kind: input, shape index: {}]   ;;  %s5722_s5 = inlined_call_operand.vmem [shape: f32[27,8,8], index: 5, kind: input, shape index: {}]   ;;  %s5723_s6 = inlined_call_operand.vmem [shape: f32[8,8], index: 6, kind: input, shape index: {}]   ;;  %s5724_s7 = inlined_call_operand.vmem [shape: f32[27,1,256], index: 7, kind: input, shape index: {}]   ;;  %s5725_s8 = inlined_call_operand.vmem [shape: f32[8,4], index: 8, kind: input, shape index: {}]   ;;  %s5726_s9 = inlined_call_operand.hbm [shape: f32[16,256], index: 9, kind: output, shape index: {}]  }
   0x1   :  { %16 = vsyncpa [#allocation4 + $0x1], 0  ;;  %s4676_s30 = smov 0   ;;  %s4678_s10 = smov 0  }
   0x2   :  { %s4680_s11 = smov 0   ;;  %s4682_s12 = smov 0  }
   0x3 LB: > { %s4697_s13 = sadd.s32 4294967295, %s4575_s12   ;;  %s4249_s14 = sadd.s32 4294967294, %s4575_s12   ;;  %s4575_s12 = sphi %s4682_s12, %s5782_s12   ;;  %s4571_s11 = sphi %s4680_s11, %s5781_s11   ;;  %s4567_s10 = sphi %s4678_s10, %s5780_s10   ;;  %s4563_s30 = sphi %s4676_s30, %s5779_s30  }
   0x4   : > { %s4701_s15 = sadd.s32 1, %s4575_s12   ;;  %s223_s16 = sadd.s32 1, %s4571_s11 }
   0x5   : > { %s220_s17 = ssub.s32 %s4575_s12, %s4701_s15  ;;  %p233_p0 = scmp.ne.s32.totalorder %s4571_s11, %s4567_s10 }
   0x6   : > { %p221_p1 = scmp.eq.s32.totalorder %s220_s17, 0  ;;  %p234_p2 = scmp.eq.s32.totalorder %s4697_s13, 1 }
   0x7   : > { %p239_p3 = scmp.ne.s32.totalorder %s4567_s10, %s4563_s30  ;;  %p240_p4 = scmp.eq.s32.totalorder %s4249_s14, 1 }
   0x8   : > { %s4712_s18 = scalar_select %p221_p1, %s4571_s11, %s223_s16  }
   0x9   : > { %p4714_p5 = por %p234_p2, %p233_p0  ;;  %p4718_p6 = por %p240_p4, %p239_p3 }
   0xa   : > { %p4252_p7 = scmp.ge.s32.totalorder %s4575_s12, 1  ;;  %p290_p8 = scmp.lt.s32.totalorder %s4575_s12, 3 }
   0xc   : > { %p291_p9 = pnand %p4252_p7, %p290_p8 }
   0xd   : > { %p326_p10 = scmp.lt.s32.totalorder (!%p291_p9), %s4697_s13, 1  ;;  %s4579_s25 = smov (!%p291_p9), 96  }
   0xe   : > { %294 = sbr.rel (%p291_p9) target bundleno = 1542 (0x606), region = 56  ;;  %s5729_s29 = smov (!%p291_p9), 80  }
   0xf   : > { %s4582_s21 = smov (!%p291_p9), 79   ;;  %s4583_s26 = smov (!%p291_p9), 81  }
  0x10   : > { %s4585_s23 = smov (!%p291_p9), 97   ;;  %s4586_s28 = smov (!%p291_p9), 111  }
  0x11   : > { %s5727_s17 = smov (!%p291_p9), 112   ;;  %s4593_s27 = smov (!%p291_p9), 99  }
  0x12   : > { %s4594_s14 = smov (!%p291_p9), 13  }
  0x13   : > { %v384_v0 = vld [vmem:[%s5718_s1 + $0xf8] sm:$0xff]  ;;  %v383_v2 = vld [vmem:[%s5718_s1 + $0xf0] sm:$0xff]  ;;  %v382_v4 = vld [vmem:[%s5718_s1 + $0xe8] sm:$0xff]  ;;  %s327_s16 = scalar_select %p326_p10, %s4697_s13, 1  ;;  %v4577_v34 = vmov 0.0   ;;  %vm4578_vm0 = vmmov 0   ;;  %v738_v36 = vlaneseq }
  0x14   : > { %v368_v1 = vld [vmem:[%s5718_s1 + $0x78] sm:$0xff]  ;;  %4352 = vmatprep.subr.mxu0 %v384_v0  ;;  %v367_v3 = vld [vmem:[%s5718_s1 + $0x70] sm:$0xff]  ;;  %v366_v5 = vld [vmem:[%s5718_s1 + $0x68] sm:$0xff]  ;;  %4389 = vmatprep.subr.mxu1 %v4577_v34  ;;  %333 = vst [vmem:[#allocation2] sm:$0xff] %v4577_v34  ;;  %v4580_v37 = vmov 2   ;;  %vm349_vm1 = vcmask 1048320  }
  0x15   : > { %4353 = vmatpush3.msra.mxu0 %v368_v1  ;;  %v381_v6 = vld [vmem:[%s5718_s1 + $0xe0] sm:$0xff]  ;;  %s4350_s24 = sshll.u32 %s327_s16, 4  ;;  %v380_v8 = vld [vmem:[%s5718_s1 + $0xd8] sm:$0xff]  ;;  %v379_v10 = vld [vmem:[%s5718_s1 + $0xd0] sm:$0xff]  ;;  %335 = vst [vmem:[#allocation2 + $0x10] sm:$0xff] %v4577_v34  ;;  %4391 = vmatprep.mubr.msk.f32.mxu1 %vm4578_vm0, %v4577_v34  ;;  %v739_v38 = vshrl.u32 %v738_v36, 7 }
  0x16   : > { %4354 = vmatprep.subr.mxu0 %v383_v2  ;;  %v365_v7 = vld [vmem:[%s5718_s1 + $0x60] sm:$0xff]  ;;  %v364_v9 = vld [vmem:[%s5718_s1 + $0x58] sm:$0xff]  ;;  %s4759_s22 = scalar_lea.vmem %s5717_s0, %s4350_s24  ;;  %v363_v11 = vld [vmem:[%s5718_s1 + $0x50] sm:$0xff]  ;;  %4481 = vset.pattern.permute.xlu0 %v4580_v37  ;;  %s4584_s24 = smov 95   ;;  %vm344_vm2 = vcmask 785408   ;;  %vm462_vm3 = vcmask 64512  }
  0x17   : > { %4355 = vmatpush3.msra.mxu0 %v367_v3  ;;  %v378_v12 = vld [vmem:[%s5718_s1 + $0xc8] sm:$0xff]  ;;  %v377_v15 = vld [vmem:[%s5718_s1 + $0xc0] sm:$0xff]  ;;  %v376_v17 = vld [vmem:[%s5718_s1 + $0xb8] sm:$0xff]  ;;  %v4841_v40 = vsub.s32 1, %v739_v38  ;;  %v4843_v41 = vsub.s32 0, %v739_v38  ;;  %s4598_s16 = smov 21  }
  0x18   : > { %4356 = vmatprep.subr.mxu0 %v382_v4  ;;  %v332_v13 = vld [vmem:[%s4759_s22 + $0x8] sm:$0xff]  ;;  %v361_v16 = vld [vmem:[%s5718_s1 + $0x40] sm:$0xff]  ;;  %v360_v18 = vld [vmem:[%s5718_s1 + $0x38] sm:$0xff]  ;;  %vm750_vm4 = vcmask 646144   ;;  %vm1090_vm5 = vcmask 777216   ;;  %vm1319_vm6 = vcmask 793600  }
  0x19   : > { %4357 = vmatpush3.msra.mxu0 %v366_v5  ;;  %v362_v14 = vld [vmem:[%s5718_s1 + $0x48] sm:$0xff]  ;;  %449 = vmatprep.mubr.f32.mxu0 %v332_v13  ;;  %v375_v19 = vld [vmem:[%s5718_s1 + $0xb0] sm:$0xff]  ;;  %v373_v23 = vld [vmem:[%s5718_s1 + $0xa0] sm:$0xff]  ;;  %vm1549_vm7 = vcmask 916480   ;;  %vm1778_vm8 = vcmask 367616   ;;  %vm2006_vm9 = vcmask 416768  }
  0x1a   : > { %4358 = vmatprep.subr.mxu0 %v381_v6  ;;  %v359_v20 = vld [vmem:[%s5718_s1 + $0x30] sm:$0xff]  ;;  %v374_v21 = vld [vmem:[%s5718_s1 + $0xa8] sm:$0xff]  ;;  %v357_v24 = vld [vmem:[%s5718_s1 + $0x20] sm:$0xff]  ;;  %vm336_vm10 = vcmask 523264   ;;  %vm2467_vm11 = vcmask 105472   ;;  %vm2695_vm12 = vcmask 154624  }
  0x1b   : > { %4359 = vmatpush3.msra.mxu0 %v365_v7  ;;  %v358_v22 = vld [vmem:[%s5718_s1 + $0x28] sm:$0xff]  ;;  %v372_v25 = vld [vmem:[%s5718_s1 + $0x98] sm:$0xff]  ;;  %v371_v27 = vld [vmem:[%s5718_s1 + $0x90] sm:$0xff]  ;;  %337 = vst.msk [vmem:[#allocation2 + $0x18] sm:$0xff] %vm336_vm10, %v4577_v34  ;;  %vm546_vm13 = vcmask 130048   ;;  %vm3153_vm14 = vcmask 744448  }
  0x1c   : > { %4360 = vmatprep.subr.mxu0 %v380_v8  ;;  %v356_v26 = vld [vmem:[%s5718_s1 + $0x18] sm:$0xff]  ;;  %v355_v28 = vld [vmem:[%s5718_s1 + $0x10] sm:$0xff]  ;;  %v370_v29 = vld [vmem:[%s5718_s1 + $0x88] sm:$0xff]  ;;  %vm3381_vm15 = vcmask 826368   ;;  %vm774_vm0 = vcmask 654336   ;;  %vm2810_vm10 = vcmask 89088  }
  0x1d   : > { %4361 = vmatpush3.msra.mxu0 %v364_v9  ;;  %v354_v30 = vld [vmem:[%s5718_s1 + $0x8] sm:$0xff]  ;;  %v369_v31 = vld [vmem:[%s5718_s1 + $0x80] sm:$0xff]  ;;  %v4282_v1 = vld [vmem:[%s5724_s7 + $0x10] sm:$0x3] }
  0x1e   : > { %4362 = vmatprep.subr.mxu0 %v379_v10  ;;  %v353_v32 = vld [vmem:[%s5718_s1] sm:$0xff]  ;;  %v4270_v53 = vld [vmem:[%s5724_s7 + $0x8] sm:$0x3]  ;;  %v4273_v56 = vld [vmem:[%s5724_s7 + $0xa] sm:$0x3]  ;;  %v1654_v2 = vrot.slane %v4282_v1, %v4843_v41  ;;  %v1658_v3 = vrot.slane %v4282_v1, %v4841_v40 }
  0x1f   : > { %4363 = vmatpush3.msra.mxu0 %v363_v11  ;;  %v331_v33 = vld [vmem:[%s4759_s22] sm:$0xff]  ;;  %v1196_v54 = vrot.slane %v4270_v53, %v4843_v41  ;;  %v1200_v55 = vrot.slane %v4270_v53, %v4841_v40  ;;  %v1310_v57 = vrot.slane %v4273_v56, %v4843_v41  ;;  %v1314_v58 = vrot.slane %v4273_v56, %v4841_v40  ;;  %v4276_v59 = vld [vmem:[%s5724_s7 + $0xc] sm:$0x3]  ;;  %v4279_v62 = vld [vmem:[%s5724_s7 + $0xe] sm:$0x3] }
  0x20   : > { %4364 = vmatprep.subr.mxu0 %v378_v12  ;;  %v456_v35 = vld [vmem:[%s5725_s8] sm:$0xff]  ;;  %340 = vrot.lane.b32.xlu1 %v331_v33, %s4579_s25  ;;  %v1425_v60 = vrot.slane %v4276_v59, %v4843_v41  ;;  %v1429_v61 = vrot.slane %v4276_v59, %v4841_v40  ;;  %v1540_v63 = vrot.slane %v4279_v62, %v4843_v41  ;;  %v4285_v4 = vld [vmem:[%s5724_s7 + $0x12] sm:$0x3]  ;;  %v4288_v7 = vld [vmem:[%s5724_s7 + $0x14] sm:$0x3] }
  0x21   : > { %4365 = vmatpush3.msra.mxu0 %v362_v14  ;;  %459 = vperm.xlu0 %4481, %v456_v35   ;;  %v4260_v39 = vld [vmem:[%s5724_s7 + $0x2] sm:$0x3]  ;;  %v736_v42 = vld [vmem:[%s5724_s7] sm:$0x3]  ;;  %v4264_v47 = vld [vmem:[%s5724_s7 + $0x4] sm:$0x3]  ;;  %v1544_v0 = vrot.slane %v4279_v62, %v4841_v40  ;;  %v1769_v5 = vrot.slane %v4285_v4, %v4843_v41  ;;  %v1773_v6 = vrot.slane %v4285_v4, %v4841_v40 }
  0x22   : > { %4366 = vmatprep.subr.mxu0 %v377_v15  ;;  %v769_v43 = vrot.slane %v4260_v39, %v4841_v40  ;;  %v765_v44 = vrot.slane %v4260_v39, %v4843_v41  ;;  %v741_v45 = vrot.slane %v736_v42, %v4843_v41  ;;  %v745_v46 = vrot.slane %v736_v42, %v4841_v40  ;;  %v4267_v50 = vld [vmem:[%s5724_s7 + $0x6] sm:$0x3]  ;;  %v4291_v10 = vld [vmem:[%s5724_s7 + $0x16] sm:$0x3]  ;;  %v4318_v38 = vld [vmem:[%s5724_s7 + $0x28] sm:$0x3] }
  0x23   : > { %4367 = vmatpush3.msra.mxu0 %v361_v16  ;;  %v966_v48 = vrot.slane %v4264_v47, %v4843_v41  ;;  %v970_v49 = vrot.slane %v4264_v47, %v4841_v40  ;;  %v1081_v51 = vrot.slane %v4267_v50, %v4843_v41  ;;  %v1085_v52 = vrot.slane %v4267_v50, %v4841_v40  ;;  %v4297_v16 = vld [vmem:[%s5724_s7 + $0x1a] sm:$0x3]  ;;  %v4315_v35 = vld [vmem:[%s5724_s7 + $0x26] sm:$0x3]  ;;  %v4321_v42 = vld [vmem:[%s5724_s7 + $0x2a] sm:$0x3] }
  0x24   : > { %4368 = vmatprep.subr.mxu0 %v376_v17  ;;  %342 = vrot.lane.b32.xlu1 %v332_v13, %s4579_s25  ;;  %v1884_v8 = vrot.slane %v4288_v7, %v4843_v41  ;;  %v1888_v9 = vrot.slane %v4288_v7, %v4841_v40  ;;  %v1997_v11 = vrot.slane %v4291_v10, %v4843_v41  ;;  %v4294_v13 = vld [vmem:[%s5724_s7 + $0x18] sm:$0x3]  ;;  %v4993_v50 = vld [vmem:[%s5724_s7 + $0x32] sm:$0x3] }
  0x25   : > { %4369 = vmatpush3.msra.mxu0 %v360_v18  ;;  %770 = vrot.lane.b32.xlu0 %v765_v44, %s5729_s29  ;;  %v2001_v12 = vrot.slane %v4291_v10, %v4841_v40  ;;  %v2112_v14 = vrot.slane %v4294_v13, %v4843_v41  ;;  %v2116_v15 = vrot.slane %v4294_v13, %v4841_v40  ;;  %v4969_v44 = vld [vmem:[%s5724_s7 + $0x2c] sm:$0x3] }
  0x26   : > { %4370 = vmatprep.subr.mxu0 %v375_v19  ;;  %v2227_v17 = vrot.slane %v4297_v16, %v4843_v41  ;;  %v2231_v18 = vrot.slane %v4297_v16, %v4841_v40  ;;  %v4300_v19 = vld [vmem:[%s5724_s7 + $0x1c] sm:$0x3]  ;;  %v2916_v36 = vrot.slane %v4315_v35, %v4843_v41  ;;  %v2920_v37 = vrot.slane %v4315_v35, %v4841_v40 }
  0x27   : > { %4371 = vmatpush3.msra.mxu0 %v359_v20  ;;  %v2340_v20 = vrot.slane %v4300_v19, %v4843_v41  ;;  %v3033_v39 = vrot.slane %v4318_v38, %v4841_v40  ;;  %v3029_v4 = vrot.slane %v4318_v38, %v4843_v41 }
  0x28   : > { %4372 = vmatprep.subr.mxu0 %v374_v21  ;;  %772 = vrot.lane.b32.xlu1 %v769_v43, %s5729_s29  ;;  %v2344_v21 = vrot.slane %v4300_v19, %v4841_v40  ;;  %v3148_v43 = vrot.slane %v4321_v42, %v4841_v40  ;;  %s5740_s29 = smov 83  }
  0x29   : > { %4373 = vmatpush3.msra.mxu0 %v358_v22  ;;  %746 = vrot.lane.b32.xlu0 %v741_v45, %s4582_s21  ;;  %v4303_v22 = vld [vmem:[%s5724_s7 + $0x1e] sm:$0x3]  ;;  %v3263_v45 = vrot.slane %v4969_v44, %v4841_v40 }
  0x2a   : > { %4374 = vmatprep.subr.mxu0 %v373_v23  ;;  %v2458_v23 = vrot.slane %v4303_v22, %v4843_v41 }
  0x2b   : > { %4375 = vmatpush3.msra.mxu0 %v357_v24  ;;  %v2462_v24 = vrot.slane %v4303_v22, %v4841_v40  ;;  %v545_v22 = vld [vmem:[%s5719_s2 + $0x18] sm:$0xff] }
  0x2c   : > { %4376 = vmatprep.subr.mxu0 %v372_v25  ;;  %748 = vrot.lane.b32.xlu1 %v745_v46, %s4582_s21  ;;  %s4590_s21 = smov 48   ;;  %v4306_v25 = vld [vmem:[%s5724_s7 + $0x20] sm:$0x3]  ;;  %v4977_v46 = vld [vmem:[%s5724_s7 + $0x2e] sm:$0x3] }
  0x2d   : > { %4377 = vmatpush3.msra.mxu0 %v356_v26  ;;  %971 = vrot.lane.b32.xlu0 %v966_v48, %s4583_s26  ;;  %v2573_v26 = vrot.slane %v4306_v25, %v4843_v41  ;;  %v3376_v47 = vrot.slane %v4977_v46, %v4841_v40  ;;  %v4985_v48 = vld [vmem:[%s5724_s7 + $0x30] sm:$0x3] }
  0x2e   : > { %4378 = vmatprep.subr.mxu0 %v371_v27  ;;  %v2577_v27 = vrot.slane %v4306_v25, %v4841_v40  ;;  %v543_v25 = vld [vmem:[%s5719_s2 + $0x8] sm:$0xff] }
  0x2f   : > { %4379 = vmatpush3.msra.mxu0 %v355_v28  ;;  %v4309_v28 = vld [vmem:[%s5724_s7 + $0x22] sm:$0x3] }
  0x30   : > { %4380 = vmatprep.subr.mxu0 %v370_v29  ;;  %973 = vrot.lane.b32.xlu1 %v970_v49, %s4583_s26  ;;  %s4591_s26 = smov 51   ;;  %v2686_v29 = vrot.slane %v4309_v28, %v4843_v41  ;;  %v3491_v49 = vrot.slane %v4985_v48, %v4841_v40 }
  0x31   : > { %4381 = vmatpush3.msra.mxu0 %v354_v30  ;;  %1086 = vrot.lane.b32.xlu0 %v1081_v51, %s4584_s24  ;;  %v2690_v30 = vrot.slane %v4309_v28, %v4841_v40  ;;  %v3606_v51 = vrot.slane %v4993_v50, %v4841_v40 }
  0x32   : > { %4382 = vmatprep.subr.mxu0 %v369_v31  ;;  %v4312_v31 = vld [vmem:[%s5724_s7 + $0x24] sm:$0x3] }
  0x33   : > { %4383 = vmatpush3.msra.mxu0 %v353_v32  ;;  %v2801_v32 = vrot.slane %v4312_v31, %v4843_v41 }
  0x34   : > { %450 = vmatmul.mubr.f32.vlgmr.msra.gmra.mxu0 %v331_v33  ;;  %1088 = vrot.lane.b32.xlu1 %v1085_v52, %s4584_s24  ;;  %s4592_s24 = smov 93   ;;  %v2805_v33 = vrot.slane %v4312_v31, %v4841_v40 }
  0x35   : > { %1525 = vmatprep.mubr.f32.mxu0 %v4577_v34  ;;  %1201 = vrot.lane.b32.xlu0 %v1196_v54, %s4579_s25 }
  0x38   : > { %1203 = vrot.lane.b32.xlu1 %v1200_v55, %s4579_s25 }
  0x39   : > { %1315 = vrot.lane.b32.xlu0 %v1310_v57, %s4585_s23 }
  0x3c   : > { %1317 = vrot.lane.b32.xlu1 %v1314_v58, %s4585_s23  ;;  %s4588_s23 = smov 113   ;;  %v455_v58 = vld [vmem:[%s5721_s4] sm:$0xff] }
  0x3d   : > { %1430 = vrot.lane.b32.xlu0 %v1425_v60, %s4586_s28 }
  0x40   : > { %1432 = vrot.lane.b32.xlu1 %v1429_v61, %s4586_s28  ;;  %s4589_s28 = smov 45  }
  0x41   : > { %1545 = vrot.lane.b32.xlu0 %v1540_v63, %s5727_s17 }
  0x44   : > { %1547 = vrot.lane.b32.xlu1 %v1544_v0, %s5727_s17  ;;  %v5022_v0 = vld [vmem:[%s5724_s7 + $0x34] sm:$0x3]  ;;  %s5733_s17 = smov 49  }
  0x45   : > { %1659 = vrot.lane.b32.xlu0 %v1654_v2, %s4588_s23  ;;  %v3715_v1 = vrot.slane %v5022_v0, %v4843_v41 }
  0x48   : > { %1661 = vrot.lane.b32.xlu1 %v1658_v3, %s4588_s23  ;;  %s4597_s23 = smov 11  }
  0x49   : > { %1774 = vrot.lane.b32.xlu0 %v1769_v5, %s4589_s28 }
  0x4c   : > { %1776 = vrot.lane.b32.xlu1 %v1773_v6, %s4589_s28  ;;  %s4601_s28 = smov 43  }
  0x4d   : > { %1889 = vrot.lane.b32.xlu0 %v1884_v8, %s4590_s21  ;;  %v3144_v8 = vrot.slane %v4321_v42, %v4843_v41 }
  0x50   : > { %1891 = vrot.lane.b32.xlu1 %v1888_v9, %s4590_s21 }
  0x51   : > { %2002 = vrot.lane.b32.xlu0 %v1997_v11, %s4591_s26 }
  0x54   : > { %2004 = vrot.lane.b32.xlu1 %v2001_v12, %s4591_s26  ;;  %s5750_s26 = smov 16  }
  0x55   : > { %2117 = vrot.lane.b32.xlu0 %v2112_v14, %s4592_s24 }
  0x58   : > { %2119 = vrot.lane.b32.xlu1 %v2116_v15, %s4592_s24  ;;  %s4596_s24 = smov 19   ;;  %v3259_v15 = vrot.slane %v4969_v44, %v4843_v41 }
  0x59   : > { %2232 = vrot.lane.b32.xlu0 %v2227_v17, %s4579_s25 }
  0x5c   : > { %2234 = vrot.lane.b32.xlu1 %v2231_v18, %s4579_s25  ;;  %v3372_v18 = vrot.slane %v4977_v46, %v4843_v41 }
  0x5d   : > { %2345 = vrot.lane.b32.xlu0 %v2340_v20, %s4593_s27 }
  0x60   : > { %2347 = vrot.lane.b32.xlu1 %v2344_v21, %s4593_s27  ;;  %s4599_s27 = smov 91  }
  0x61   : > { %2463 = vrot.lane.b32.xlu0 %v2458_v23, %s4594_s14  ;;  %v544_v23 = vld [vmem:[%s5719_s2 + $0x10] sm:$0xff] }
  0x64   : > { %2465 = vrot.lane.b32.xlu1 %v2462_v24, %s4594_s14  ;;  %s4600_s14 = smov 101  }
  0x65   : > { %2578 = vrot.lane.b32.xlu0 %v2573_v26, %s5750_s26  ;;  %v3487_v26 = vrot.slane %v4985_v48, %v4843_v41 }
  0x68   : > { %2580 = vrot.lane.b32.xlu1 %v2577_v27, %s5750_s26  ;;  %v542_v27 = vld [vmem:[%s5719_s2] sm:$0xff] }
  0x69   : > { %2691 = vrot.lane.b32.xlu0 %v2686_v29, %s4596_s24 }
  0x6c   : > { %2693 = vrot.lane.b32.xlu1 %v2690_v30, %s4596_s24  ;;  %s5734_s24 = smov 53  }
  0x6d   : > { %2806 = vrot.lane.b32.xlu0 %v2801_v32, %s4597_s23 }
  0x70   : > { %2808 = vrot.lane.b32.xlu1 %v2805_v33, %s4597_s23  ;;  %s5735_s23 = smov 35  }
  0x71   : > { %2921 = vrot.lane.b32.xlu0 %v2916_v36, %s5750_s26 }
  0x74   : > { %2923 = vrot.lane.b32.xlu1 %v2920_v37, %s5750_s26 }
  0x75   : > { %3034 = vrot.lane.b32.xlu0 %v3029_v4, %s4598_s16 }
  0x78   : > { %3036 = vrot.lane.b32.xlu1 %v3033_v39, %s4598_s16  ;;  %s5731_s16 = smov 47  }
  0x79   : > { %3149 = vrot.lane.b32.xlu0 %v3144_v8, %s4599_s27 }
  0x7c   : > { %3151 = vrot.lane.b32.xlu1 %v3148_v43, %s4599_s27  ;;  %s4605_s27 = smov 33  }
  0x7d   : > { %3264 = vrot.lane.b32.xlu0 %v3259_v15, %s4579_s25 }
  0x80   : > { %3266 = vrot.lane.b32.xlu1 %v3263_v45, %s4579_s25  ;;  %s5759_s25 = smov 80  }
  0x81   : > { %3377 = vrot.lane.b32.xlu0 %v3372_v18, %s4600_s14 }
  0x84   : > { %3379 = vrot.lane.b32.xlu1 %v3376_v47, %s4600_s14  ;;  %s5737_s14 = smov 77  }
  0x85   : > { %3492 = vrot.lane.b32.xlu0 %v3487_v26, %s4601_s28  ;;  %v5161_v26 = vld [vmem:[#allocation2 + $0x18] sm:$0xff] }
  0x88   : > { %3494 = vrot.lane.b32.xlu1 %v3491_v49, %s4601_s28  ;;  %s5751_s28 = smov 17  }
  0x8c   : > { %3609 = vrot.lane.b32.xlu1 %v3606_v51, %s4590_s21 }
  0x92   : > { %v341_v52 = vpop.permute.xlu1 %340 }
  0x93   : > { %350 = vst.msk [vmem:[#allocation2] sm:$0xff] %vm349_vm1, %v341_v52  ;;  %vm975_vm1 = vcmask 662528  }
  0x96   : > { %v343_v53 = vpop.permute.xlu1 %342 }
  0x97   : > { %v5000_v54 = vsel %vm344_vm2, %v341_v52, %v343_v53  ;;  %352 = vst.msk [vmem:[#allocation2 + $0x10] sm:$0xff] %vm344_vm2, %v343_v53 }
  0x9a   : > { %v5006_v59 = vpop.permute.xlu1 %772  ;;  %v5033_v7 = vld [vmem:[#allocation2] sm:$0xff] }
  0x9c   : > { %v5015_v62 = vpop.permute.xlu0 %459 }
  0x9e   : > { %v5008_v60 = vld [vmem:[#allocation2 + $0x10] sm:$0xff]  ;;  %v5027_v3 = vpop.permute.xlu1 %748 }
  0x9f   : > { %v781_v61 = vmul.f32 %v5006_v59, %v5008_v60 }
  0xa0   : > { %v5017_v63 = vpop.permute.xlu0 %770 }
  0xa1   : > { %791 = vrot.lane.b32.xlu1 %v781_v61, %s4590_s21 }
  0xa2   : > { %v5042_v11 = vpop.permute.xlu1 %973 }
  0xa3   : > { %v982_v12 = vmul.f32 %v5042_v11, %v5008_v60 }
  0xa4   : > { %v747_v2 = vpop.permute.xlu0 %746 }
  0xa5   : > { %3720 = vrot.lane.b32.xlu1 %v3715_v1, %s5734_s24  ;;  %v751_v5 = vsel %vm750_vm4, %v747_v2, %v5027_v3  ;;  %v755_v9 = vmul.f32 %v747_v2, %v5033_v7  ;;  %s5753_s24 = smov 31   ;;  %vm1434_vm4 = vcmask 908288  }
  0xa6   : > { %v756_v6 = vmul.f32 %v751_v5, %v5000_v54  ;;  %v5047_v14 = vpop.permute.xlu1 %1088 }
  0xa8   : > { %v5039_v10 = vpop.permute.xlu0 %971 }
  0xa9   : > { %877 = vrot.lane.b32.xlu1 %v756_v6, %s5733_s17 }
  0xaa   : > { %v5061_v21 = vpop.permute.xlu1 %1203 }
  0xab   : > { %v1211_v24 = vmul.f32 %v5061_v21, %v5008_v60 }
  0xac   : > { %v1087_v13 = vpop.permute.xlu0 %1086 }
  0xad   : > { %875 = vrot.lane.b32.xlu1 %v755_v9, %s5733_s17  ;;  %v1091_v16 = vsel %vm1090_vm5, %v1087_v13, %v5047_v14  ;;  %v1095_v19 = vmul.f32 %v1087_v13, %v5033_v7  ;;  %s5748_s17 = smov 15   ;;  %vm1663_vm5 = vcmask 924672  }
  0xae   : > { %v1096_v17 = vmul.f32 %v1091_v16, %v5000_v54  ;;  %v5080_v29 = vpop.permute.xlu1 %1317 }
  0xb0   : > { %v5059_v20 = vpop.permute.xlu0 %1201 }
  0xb1   : > { %992 = vrot.lane.b32.xlu1 %v982_v12, %s5731_s16  ;;  %s5755_s16 = smov 32  }
  0xb2   : > { %v5088_v33 = vpop.permute.xlu1 %1432 }
  0xb3   : > { %v1441_v35 = vmul.f32 %v5088_v33, %v5008_v60 }
  0xb4   : > { %v1316_v28 = vpop.permute.xlu0 %1315 }
  0xb5   : > { %1105 = vrot.lane.b32.xlu1 %v1096_v17, %s4605_s27  ;;  %v1320_v30 = vsel %vm1319_vm6, %v1316_v28, %v5080_v29  ;;  %v1324_v32 = vmul.f32 %v1316_v28, %v5033_v7  ;;  %vm793_vm6 = vcmask 392192  }
  0xb6   : > { %v1325_v31 = vmul.f32 %v1320_v30, %v5000_v54  ;;  %v5095_v37 = vpop.permute.xlu1 %1547 }
  0xb8   : > { %v5092_v36 = vpop.permute.xlu0 %1430 }
  0xb9   : > { %1103 = vrot.lane.b32.xlu1 %v1095_v19, %s4605_s27 }
  0xba   : > { %v5103_v44 = vpop.permute.xlu1 %1661 }
  0xbb   : > { %v1670_v45 = vmul.f32 %v5103_v44, %v5008_v60 }
  0xbc   : > { %v1546_v38 = vpop.permute.xlu0 %1545 }
  0xbd   : > { %1221 = vrot.lane.b32.xlu1 %v1211_v24, %s5755_s16  ;;  %v1550_v39 = vsel %vm1549_vm7, %v1546_v38, %v5095_v37  ;;  %v1554_v43 = vmul.f32 %v1546_v38, %v5033_v7 }
  0xbe   : > { %v1555_v42 = vmul.f32 %v1550_v39, %v5000_v54  ;;  %v5110_v47 = vpop.permute.xlu1 %1776 }
  0xc0   : > { %v5107_v46 = vpop.permute.xlu0 %1659 }
  0xc1   : > { %1334 = vrot.lane.b32.xlu1 %v1325_v31, %s5753_s24 }
  0xc2   : > { %v5117_v53 = vpop.permute.xlu1 %1891 }
  0xc4   : > { %v1775_v48 = vpop.permute.xlu0 %1774 }
  0xc5   : > { %1332 = vrot.lane.b32.xlu1 %v1324_v32, %s5753_s24  ;;  %v1779_v49 = vsel %vm1778_vm8, %v1775_v48, %v5110_v47  ;;  %v1783_v52 = vmul.f32 %v1775_v48, %v5033_v7  ;;  %s5762_s24 = smov 49   ;;  %vm2121_vm8 = vcmask 760832  }
  0xc6   : > { %v1784_v51 = vmul.f32 %v1779_v49, %v5000_v54 }
  0xc9   : > { %1451 = vrot.lane.b32.xlu1 %v1441_v35, %s5751_s28  ;;  %s5763_s28 = smov 47  }
  0xcd   : > { %1564 = vrot.lane.b32.xlu1 %v1555_v42, %s5750_s26 }
  0xd1   : > { %1562 = vrot.lane.b32.xlu1 %v1554_v43, %s5750_s26  ;;  %s4620_s26 = smov 85  }
  0xd5   : > { %1680 = vrot.lane.b32.xlu1 %v1670_v45, %s5748_s17  ;;  %s5767_s17 = smov 16  }
  0xd9   : > { %1793 = vrot.lane.b32.xlu1 %v1784_v51, %s5740_s29 }
  0xdd   : > { %1791 = vrot.lane.b32.xlu1 %v1783_v52, %s5740_s29  ;;  %s5744_s29 = smov 109  }
  0xf4   : > { %v4384_v55 = vpop.f32.mrf.mxu0 }
  0xf6   : > { %v4385_v56 = vpop.f32.mrf.mxu0 }
  0xf7   : > { %v4386_v57 = vadd.f32 %v4385_v56, %v4384_v55  ;;  %v1899_v55 = vmul.f32 %v5117_v53, %v5008_v60  ;;  %v5121_v56 = vpop.permute.xlu0 %1889 }
  0xf9   : > { %4390 = vmatpush3.msra.mxu1 %v4386_v57  ;;  %v5124_v57 = vpop.permute.xlu1 %2004  ;;  %1909 = vrot.lane.b32.xlu1 %v1899_v55, %s5759_s25 }
  0xfa   : > { %4392 = vmatmul.mubr.msk.f32.vlgmr.msra.gmra.mxu1 %vm462_vm3, %v455_v58  ;;  %578 = vmatprep.subr.mxu1 %v545_v22 }
  0xfb   : > { %614 = vmatprep.mubr.f32.mxu1 %v4577_v34  ;;  %579 = vmatpush1.msra.mxu1 %v544_v23  ;;  %v2003_v58 = vpop.permute.xlu0 %2002 }
  0xfc   : > { %580 = vmatprep.subr.mxu1 %v543_v25  ;;  %v2007_v61 = vsel %vm2006_vm9, %v2003_v58, %v5124_v57  ;;  %v2011_v2 = vmul.f32 %v2003_v58, %v5033_v7  ;;  %vm2349_vm9 = vcmask 809984  }
  0xfd   : > { %581 = vmatpush1.msra.mxu1 %v542_v27  ;;  %v2012_v1 = vmul.f32 %v2007_v61, %v5000_v54  ;;  %v5131_v4 = vpop.permute.xlu1 %2119 }
  0xfe   : > { %v2128_v5 = vmul.f32 %v5131_v4, %v5008_v60 }
  0xff   : > { %2021 = vrot.lane.b32.xlu1 %v2012_v1, %s5737_s14  ;;  %v5136_v6 = vpop.permute.xlu0 %2117 }
 0x101   : > { %v5139_v8 = vpop.permute.xlu1 %2234 }
 0x103   : > { %2019 = vrot.lane.b32.xlu1 %v2011_v2, %s5737_s14  ;;  %v2233_v9 = vpop.permute.xlu0 %2232  ;;  %s5741_s14 = smov 115  }
 0x104   : > { %v2236_v12 = vsel %vm344_vm2, %v2233_v9, %v5139_v8  ;;  %v2240_v15 = vmul.f32 %v2233_v9, %v5033_v7 }
 0x105   : > { %v2241_v13 = vmul.f32 %v2236_v12, %v5000_v54  ;;  %v5147_v16 = vpop.permute.xlu1 %2347 }
 0x106   : > { %v2356_v17 = vmul.f32 %v5147_v16, %v5008_v60 }
 0x107   : > { %2138 = vrot.lane.b32.xlu1 %v2128_v5, %s5735_s23  ;;  %v5151_v18 = vpop.permute.xlu0 %2345  ;;  %s5738_s23 = smov 29  }
 0x109   : > { %v5154_v19 = vpop.permute.xlu1 %2465 }
 0x10b   : > { %2250 = vrot.lane.b32.xlu1 %v2241_v13, %s5755_s16  ;;  %v2464_v22 = vpop.permute.xlu0 %2463 }
 0x10c   : > { %v2468_v23 = vsel %vm2467_vm11, %v2464_v22, %v5154_v19  ;;  %v2472_v25 = vmul.f32 %v2464_v22, %v5000_v54  ;;  %vm3038_vm11 = vcmask 171008  }
 0x10d   : > { %v2473_v24 = vmul.f32 %v2468_v23, %v5008_v60  ;;  %v5163_v27 = vpop.permute.xlu1 %2580 }
 0x10e   : > { %v2588_v28 = vmul.f32 %v5163_v27, %v5161_v26 }
 0x10f   : > { %2248 = vrot.lane.b32.xlu1 %v2240_v15, %s5755_s16  ;;  %v5167_v30 = vpop.permute.xlu0 %2578 }
 0x111   : > { %v5170_v31 = vpop.permute.xlu1 %2693 }
 0x113   : > { %2366 = vrot.lane.b32.xlu1 %v2356_v17, %s5738_s23  ;;  %v2692_v32 = vpop.permute.xlu0 %2691  ;;  %s5760_s23 = smov 112  }
 0x114   : > { %v2696_v35 = vsel %vm2695_vm12, %v2692_v32, %v5170_v31  ;;  %v2700_v39 = vmul.f32 %v2692_v32, %v5000_v54  ;;  %vm881_vm12 = vcmask 400384  }
 0x115   : > { %v2701_v38 = vmul.f32 %v2696_v35, %v5008_v60  ;;  %v5177_v42 = vpop.permute.xlu1 %2808 }
 0x116   : > { %v2817_v43 = vmul.f32 %v5177_v42, %v5008_v60 }
 0x117   : > { %2482 = vrot.lane.b32.xlu1 %v2473_v24, %s5741_s14  ;;  %v5181_v45 = vpop.permute.xlu0 %2806 }
 0x119   : > { %v5184_v48 = vpop.permute.xlu1 %2923 }
 0x11b   : > { %2480 = vrot.lane.b32.xlu1 %v2472_v25, %s5741_s14  ;;  %v2922_v49 = vpop.permute.xlu0 %2921  ;;  %s5742_s14 = smov 117  }
 0x11c   : > { %v2925_v51 = vsel %vm546_vm13, %v2922_v49, %v5184_v48  ;;  %v2929_v55 = vmul.f32 %v2922_v49, %v5033_v7 }
 0x11d   : > { %v2930_v52 = vmul.f32 %v2925_v51, %v5000_v54  ;;  %v5192_v58 = vpop.permute.xlu1 %3036 }
 0x11e   : > { %v3045_v61 = vmul.f32 %v5192_v58, %v5008_v60 }
 0x11f   : > { %2598 = vrot.lane.b32.xlu1 %v2588_v28, %s5760_s23  ;;  %v5196_v1 = vpop.permute.xlu0 %3034 }
 0x121   : > { %v5199_v2 = vpop.permute.xlu1 %3151 }
 0x123   : > { %2710 = vrot.lane.b32.xlu1 %v2701_v38, %s5744_s29  ;;  %v3150_v5 = vpop.permute.xlu0 %3149 }
 0x124   : > { %v3154_v9 = vsel %vm3153_vm14, %v3150_v5, %v5199_v2  ;;  %v3158_v13 = vmul.f32 %v3150_v5, %v5033_v7  ;;  %vm994_vm14 = vcmask 384000  }
 0x125   : > { %v3159_v12 = vmul.f32 %v3154_v9, %v5000_v54  ;;  %v5206_v17 = vpop.permute.xlu1 %3266  ;;  %v622_v9 = vld [vmem:[%s5720_s3 + $0x8] sm:$0xff] }
 0x126   : > { %v3274_v24 = vmul.f32 %v5206_v17, %v5008_v60 }
 0x127   : > { %2708 = vrot.lane.b32.xlu1 %v2700_v39, %s5744_s29  ;;  %s5747_s29 = smov 37   ;;  %v5211_v25 = vpop.permute.xlu0 %3264 }
 0x129   : > { %v5214_v32 = vpop.permute.xlu1 %3379 }
 0x12b   : > { %2827 = vrot.lane.b32.xlu1 %v2817_v43, %s5742_s14  ;;  %s5745_s14 = smov 107   ;;  %v3378_v35 = vpop.permute.xlu0 %3377  ;;  %v624_v43 = vld [vmem:[%s5720_s3 + $0x18] sm:$0xff] }
 0x12c   : > { %v3382_v38 = vsel %vm3381_vm15, %v3378_v35, %v5214_v32  ;;  %v3386_v39 = vmul.f32 %v3378_v35, %v5033_v7  ;;  %657 = vmatprep.subr.mxu1 %v624_v43  ;;  %vm3496_vm15 = vcmask 351232  }
 0x12f   : > { %2939 = vrot.lane.b32.xlu1 %v2930_v52, %s5760_s23  ;;  %v5225_v52 = vpop.permute.xlu1 %3494 }
 0x133   : > { %2937 = vrot.lane.b32.xlu1 %v2929_v55, %s5760_s23  ;;  %v3503_v55 = vmul.f32 %v5225_v52, %v5161_v26 }
 0x137   : > { %3055 = vrot.lane.b32.xlu1 %v3045_v61, %s5745_s14  ;;  %s5754_s14 = smov 27   ;;  %v623_v61 = vld [vmem:[%s5720_s3 + $0x10] sm:$0xff] }
 0x13b   : > { %3168 = vrot.lane.b32.xlu1 %v3159_v12, %s5747_s29  ;;  %v3602_v12 = vrot.slane %v4993_v50, %v4843_v41  ;;  %v779_v41 = vmul.f32 %v5017_v63, %v5033_v7  ;;  %v3719_v50 = vrot.slane %v5022_v0, %v4841_v40  ;;  %v1097_v40 = vmul.f32 %v5047_v14, %v5008_v60 }
 0x13c   : > { %v1205_v0 = vsel %vm344_vm2, %v5059_v20, %v5061_v21  ;;  %v1435_v14 = vsel %vm1434_vm4, %v5092_v36, %v5088_v33  ;;  %v1664_v33 = vsel %vm1663_vm5, %v5107_v46, %v5103_v44  ;;  %v1893_v44 = vsel %vm793_vm6, %v5121_v56, %v5117_v53 }
 0x13d   : > { %v1440_v35 = vmul.f32 %v1435_v14, %v5000_v54  ;;  %v2122_v53 = vsel %vm2121_vm8, %v5136_v6, %v5131_v4  ;;  %v2350_v4 = vsel %vm2349_vm9, %v5151_v18, %v5147_v16  ;;  %v2582_v16 = vsel %vm546_vm13, %v5167_v30, %v5163_v27 }
 0x13e   : > { %v2931_v14 = vmul.f32 %v5184_v48, %v5008_v60  ;;  %vm1338_vm4 = vcmask 252928   ;;  %vm3724_vm5 = vcmask 433152   ;;  %vm1682_vm8 = vcmask 121856  }
 0x13f   : > { %3166 = vrot.lane.b32.xlu1 %v3158_v13, %s5747_s29  ;;  %v621_v13 = vld [vmem:[%s5720_s3] sm:$0xff]  ;;  %s5768_s29 = smov 15   ;;  %vm2025_vm9 = vcmask 629760  }
 0x143   : > { %3284 = vrot.lane.b32.xlu1 %v3274_v24, %s5755_s16  ;;  %s5761_s16 = smov 53   ;;  %v980_v24 = vmul.f32 %v5039_v10, %v5033_v7 }
 0x1ba   : > { %v532_v15 = vpop.f32.mrf.mxu1 }
 0x1bb   : > { %v533_v22 = vadd.f32 %v532_v15, %v5015_v62  ;;  %v3387_v62 = vmul.f32 %v3382_v38, %v5000_v54  ;;  %v775_v15 = vsel %vm774_vm0, %v5017_v63, %v5006_v59  ;;  %v757_v59 = vmul.f32 %v5027_v3, %v5008_v60 }
 0x1bc   : > { %v4393_v23 = vpop.f32.mrf.mxu1  ;;  %v1210_v3 = vmul.f32 %v1205_v0, %v5000_v54 }
 0x1bd   : > { %v4257_v28 = vmul.f32 -1.442695, %v533_v22  ;;  %3396 = vrot.lane.b32.xlu1 %v3387_v62, %s5754_s14  ;;  %v780_v22 = vmul.f32 %v775_v15, %v5000_v54  ;;  %v976_v23 = vsel %vm975_vm1, %v5039_v10, %v5042_v11  ;;  %v1209_v11 = vmul.f32 %v5059_v20, %v5033_v7 }
 0x1be   : > { %v981_v63 = vmul.f32 %v976_v23, %v5000_v54  ;;  %v1326_v10 = vmul.f32 %v5080_v29, %v5008_v60  ;;  %v1439_v20 = vmul.f32 %v5092_v36, %v5033_v7  ;;  %v1556_v29 = vmul.f32 %v5095_v37, %v5008_v60 }
 0x1bf   : > { %4486 = vpow2.f32 %v4257_v28  ;;  %v5276_v28 = vpop.permute.xlu1 %3609  ;;  %v1668_v36 = vmul.f32 %v5107_v46, %v5033_v7  ;;  %v1785_v37 = vmul.f32 %v5110_v47, %v5008_v60  ;;  %v1897_v46 = vmul.f32 %v5121_v56, %v5033_v7 }
 0x1c0   : > { %v2013_v47 = vmul.f32 %v5124_v57, %v5008_v60  ;;  %v2126_v56 = vmul.f32 %v5136_v6, %v5033_v7  ;;  %v2242_v57 = vmul.f32 %v5139_v8, %v5008_v60  ;;  %v2354_v6 = vmul.f32 %v5151_v18, %v5033_v7 }
 0x1c1   : > { %3394 = vrot.lane.b32.xlu1 %v3386_v39, %s5754_s14  ;;  %s5765_s14 = smov 31   ;;  %v1669_v39 = vmul.f32 %v1664_v33, %v5000_v54  ;;  %v2474_v8 = vmul.f32 %v5154_v19, %v5161_v26  ;;  %v2586_v18 = vmul.f32 %v5167_v30, %v5000_v54  ;;  %v2811_v23 = vsel %vm2810_vm10, %v5181_v45, %v5177_v42 }
 0x1c2   : > { %v2816_v30 = vmul.f32 %v2811_v23, %v5000_v54  ;;  %v2815_v42 = vmul.f32 %v5181_v45, %v5033_v7  ;;  %vm1223_vm1 = vcmask 261120   ;;  %vm2140_vm10 = vcmask 285696  }
 0x1c3   : > { %v5284_v21 = vpop.permute.xlu1 %791 }
 0x1c5   : > { %3513 = vrot.lane.b32.xlu1 %v3503_v55, %s4620_s26 }
 0x1c7   : > { %v5290_v38 = vpop.permute.xlu1 %3720 }
 0x1cb   : > { %v5298_v62 = vpop.permute.xlu1 %877 }
 0x1cc   : > { %v4487_v49 = vpop.eup %4486 }
 0x1cd   : > { %v539_v51 = vadd.f32 1.0, %v4487_v49 }
 0x1cf   : > { %4488 = vrcp.f32 %v539_v51  ;;  %v5304_v43 = vpop.permute.xlu1 %875  ;;  %v1898_v51 = vmul.f32 %v1893_v44, %v5000_v54 }
 0x1d3   : > { %v5313_v49 = vpop.permute.xlu1 %992 }
 0x1d7   : > { %v5319_v55 = vpop.permute.xlu1 %1105 }
 0x1dc   : > { %v4489_v5 = vpop.eup %4488 }
 0x1dd   : > { %625 = vrot.lane.b32.xlu0 %v4489_v5, %s5760_s23  ;;  %4258 = vmatmul.mubr.msk.f32.vlgmr.msra.gmra.mxu1 %vm546_vm13, %v4489_v5  ;;  %v2127_v5 = vmul.f32 %v2122_v53, %v5000_v54 }
 0x1de   : > { %658 = vmatpush1.msra.mxu1 %v623_v61  ;;  %693 = vmatprep.mubr.f32.mxu1 %v4577_v34  ;;  %v5327_v61 = vpop.permute.xlu1 %1103 }
 0x1df   : > { %659 = vmatprep.subr.mxu1 %v622_v9 }
 0x1e0   : > { %660 = vmatpush1.msra.mxu1 %v621_v13  ;;  %v2355_v13 = vmul.f32 %v2350_v4, %v5000_v54 }
 0x1e1   : > { %3607 = vrot.lane.b32.xlu0 %v3602_v12, %s4590_s21 }
 0x1e2   : > { %v5333_v9 = vpop.permute.xlu1 %1221 }
 0x1e5   : > { %789 = vrot.lane.b32.xlu0 %v780_v22, %s4590_s21 }
 0x1e6   : > { %v5341_v12 = vpop.permute.xlu1 %1334 }
 0x1e9   : > { %787 = vrot.lane.b32.xlu0 %v779_v41, %s4590_s21  ;;  %s5764_s21 = smov 32   ;;  %v2587_v41 = vmul.f32 %v2582_v16, %v5008_v60 }
 0x1ea   : > { %v5347_v15 = vpop.permute.xlu1 %1332 }
 0x1ed   : > { %3722 = vrot.lane.b32.xlu0 %v3719_v50, %s5761_s16  ;;  %s5769_s16 = smov 83   ;;  %v5362_v50 = vpop.permute.xlu0 %3492 }
 0x1ee   : > { %v5356_v22 = vpop.permute.xlu1 %1451  ;;  %v3497_v16 = vsel %vm3496_vm15, %v5362_v50, %v5225_v52  ;;  %v3501_v52 = vmul.f32 %v5362_v50, %v5000_v54  ;;  %vm3057_vm15 = vcmask 875520  }
 0x1f1   : > { %879 = vrot.lane.b32.xlu0 %v757_v59, %s5762_s24  ;;  %s5770_s24 = smov 77   ;;  %v2702_v59 = vmul.f32 %v5170_v31, %v5161_v26 }
 0x1f2   : > { %v5364_v19 = vpop.permute.xlu1 %1564 }
 0x1f5   : > { %990 = vrot.lane.b32.xlu0 %v981_v63, %s5763_s28 }
 0x1f6   : > { %v5373_v63 = vpop.permute.xlu1 %1562 }
 0x1f9   : > { %988 = vrot.lane.b32.xlu0 %v980_v24, %s5763_s28  ;;  %s5771_s28 = smov 35  }
 0x1fd   : > { %1107 = vrot.lane.b32.xlu0 %v1097_v40, %s4605_s27  ;;  %s5766_s27 = smov 17  }
 0x201   : > { %1219 = vrot.lane.b32.xlu0 %v1210_v3, %s5764_s21  ;;  %v5384_v3 = vpop.permute.xlu1 %1680 }
 0x205   : > { %1217 = vrot.lane.b32.xlu0 %v1209_v11, %s5764_s21 }
 0x209   : > { %1336 = vrot.lane.b32.xlu0 %v1326_v10, %s5765_s14  ;;  %s5772_s14 = smov 29  }
 0x20d   : > { %1449 = vrot.lane.b32.xlu0 %v1440_v35, %s5766_s27  ;;  %v4261_v35 = vld [vmem:[%s5722_s5 + $0x8] sm:$0xff] }
 0x211   : > { %1447 = vrot.lane.b32.xlu0 %v1439_v20, %s5766_s27  ;;  %s5773_s27 = smov 115   ;;  %v3039_v20 = vsel %vm3038_vm11, %v5196_v1, %v5192_v58  ;;  %v3043_v58 = vmul.f32 %v5196_v1, %v5033_v7  ;;  %v3160_v1 = vmul.f32 %v5199_v2, %v5008_v60  ;;  %v4265_v2 = vld [vmem:[%s5722_s5 + $0x10] sm:$0xff]  ;;  %vm2368_vm11 = vcmask 236544  }
 0x212   : > { %v3044_v48 = vmul.f32 %v3039_v20, %v5000_v54 }
 0x215   : > { %1566 = vrot.lane.b32.xlu0 %v1556_v29, %s5767_s17  ;;  %s5774_s17 = smov 109   ;;  %v5400_v29 = vpop.permute.xlu1 %1793 }
 0x219   : > { %1678 = vrot.lane.b32.xlu0 %v1669_v39, %s5768_s29  ;;  %v5415_v44 = vpop.permute.xlu1 %1791 }
 0x21d   : > { %1676 = vrot.lane.b32.xlu0 %v1668_v36, %s5768_s29  ;;  %s5775_s29 = smov 117   ;;  %v882_v36 = vsel %vm881_vm12, %v5304_v43, %v5298_v62  ;;  %v3268_v43 = vsel %vm344_vm2, %v5211_v25, %v5206_v17  ;;  %v5431_v53 = vpop.permute.xlu1 %1909  ;;  %vm1109_vm2 = vcmask 269312   ;;  %v3272_v17 = vmul.f32 %v5211_v25, %v5033_v7 }
 0x21e   : > { %v3388_v7 = vmul.f32 %v5214_v32, %v5008_v60  ;;  %v4271_v32 = vld [vmem:[%s5722_s5 + $0x20] sm:$0xff] }
 0x221   : > { %1795 = vrot.lane.b32.xlu0 %v1785_v37, %s5769_s16  ;;  %v5441_v4 = vpop.permute.xlu1 %2021  ;;  %s323_s16 = sand.u32 1, %s4567_s10  }
 0x225   : > { %1907 = vrot.lane.b32.xlu0 %v1898_v51, %s5759_s25 }
 0x229   : > { %1905 = vrot.lane.b32.xlu0 %v1897_v46, %s5759_s25  ;;  %v758_v46 = vld [vmem:[%s5722_s5] sm:$0xff] }
 0x22d   : > { %2023 = vrot.lane.b32.xlu0 %v2013_v47, %s5770_s24  ;;  %s4351_s24 = sshll.u32 %s4697_s13, 8  ;;  %s4625_s13 = smov [#allocation3]  }
 0x231   : > { %2136 = vrot.lane.b32.xlu0 %v2127_v5, %s5771_s28  ;;  %v3273_v5 = vmul.f32 %v3268_v43, %v5000_v54  ;;  %v4292_v43 = vld [vmem:[%s5722_s5 + $0x58] sm:$0xff] }
 0x235   : > { %2134 = vrot.lane.b32.xlu0 %v2126_v56, %s5771_s28  ;;  %s5776_s28 = smov 107  }
 0x239   : > { %2252 = vrot.lane.b32.xlu0 %v2242_v57, %s5764_s21 }
 0x23d   : > { %2364 = vrot.lane.b32.xlu0 %v2355_v13, %s5772_s14 }
 0x241   : > { %2362 = vrot.lane.b32.xlu0 %v2354_v6, %s5772_s14  ;;  %s4621_s14 = smov 75   ;;  %v4268_v6 = vld [vmem:[%s5722_s5 + $0x18] sm:$0xff] }
 0x245   : > { %2484 = vrot.lane.b32.xlu0 %v2474_v8, %s5773_s27  ;;  %v1110_v8 = vsel %vm1109_vm2, %v5327_v61, %v5319_v55  ;;  %v3502_v61 = vmul.f32 %v3497_v16, %v5008_v60  ;;  %s4188_s27 = scalar_lea.hbm %s5726_s9, %s4351_s24 }
 0x249   : > { %2596 = vrot.lane.b32.xlu0 %v2587_v41, %s5760_s23 }
 0x24d   : > { %2594 = vrot.lane.b32.xlu0 %v2586_v18, %s5760_s23 }
 0x24f   : > { %v626_v27 = vpop.permute.xlu0 %625 }
 0x250   : > { %4259 = vmatmul.mubr.msk.f32.vlgmr.msra.gmra.mxu1 %vm546_vm13, %v626_v27 }
 0x251   : > { %2712 = vrot.lane.b32.xlu0 %v2702_v59, %s5774_s17  ;;  %865 = vmatprep.mubr.f32.mxu1 %v4577_v34  ;;  %s5777_s17 = smov 37  }
 0x253   : > { %v3608_v24 = vpop.permute.xlu0 %3607 }
 0x254   : > { %v3611_v31 = vsel %vm793_vm6, %v3608_v24, %v5276_v28  ;;  %v3615_v10 = vmul.f32 %v3608_v24, %v5000_v54  ;;  %v3617_v24 = vmul.f32 %v5276_v28, %v5161_v26 }
 0x255   : > { %v3616_v40 = vmul.f32 %v3611_v31, %v5008_v60  ;;  %2825 = vrot.lane.b32.xlu0 %v2816_v30, %s5775_s29  ;;  %v4274_v30 = vld [vmem:[%s5722_s5 + $0x28] sm:$0xff]  ;;  %v1339_v31 = vsel %vm1338_vm4, %v5347_v15, %v5341_v12  ;;  %v4277_v15 = vld [vmem:[%s5722_s5 + $0x30] sm:$0xff] }
 0x257   : > { %3625 = vrot.lane.b32.xlu1 %v3616_v40, %s5759_s25  ;;  %v790_v0 = vpop.permute.xlu0 %789 }
 0x258   : > { %v795_v11 = vsel %vm793_vm6, %v790_v0, %v5284_v21 }
 0x259   : > { %2823 = vrot.lane.b32.xlu0 %v2815_v42, %s5775_s29  ;;  %831 = vmatprep.subr.mxu1 %v795_v11 }
 0x25b   : > { %3623 = vrot.lane.b32.xlu1 %v3615_v10, %s5759_s25  ;;  %v788_v45 = vpop.permute.xlu0 %787 }
 0x25c   : > { %v794_v21 = vsel %vm793_vm6, %v788_v45, %v790_v0  ;;  %vm1453_vm6 = vcmask 138240   ;;  %v1568_v45 = vsel %vm546_vm13, %v5373_v63, %v5364_v19 }
 0x25d   : > { %2941 = vrot.lane.b32.xlu0 %v2931_v14, %s5760_s23  ;;  %832 = vmatpush1.msra.mxu1 %v794_v21  ;;  %v4280_v14 = vld [vmem:[%s5722_s5 + $0x38] sm:$0xff]  ;;  %v4283_v21 = vld [vmem:[%s5722_s5 + $0x40] sm:$0xff] }
 0x25e   : > { %4262 = vmatmul.mubr.msk.f32.vlgmr.msra.gmra.mxu1 %vm462_vm3, %v4261_v35 }
 0x25f   : > { %v5404_v33 = vpop.permute.xlu0 %3722  ;;  %953 = vmatprep.mubr.f32.mxu1 %v4577_v34 }
 0x260   : > { %v3731_v39 = vmul.f32 %v5404_v33, %v5161_v26  ;;  %v3725_v40 = vsel %vm3724_vm5, %v5290_v38, %v5404_v33  ;;  %v4286_v33 = vld [vmem:[%s5722_s5 + $0x48] sm:$0xff]  ;;  %vm3515_vm5 = vcmask 695296  }
 0x261   : > { %3053 = vrot.lane.b32.xlu0 %v3044_v48, %s5776_s28  ;;  %v3730_v28 = vmul.f32 %v3725_v40, %v5008_v60 }
 0x262   : > { %3741 = vrot.lane.b32.xlu1 %v3731_v39, %s4621_s14 }
 0x263   : > { %v880_v37 = vpop.permute.xlu0 %879 }
 0x264   : > { %v883_v51 = vsel %vm881_vm12, %v5298_v62, %v880_v37  ;;  %vm2486_vm12 = vcmask 941056  }
 0x265   : > { %3051 = vrot.lane.b32.xlu0 %v3043_v58, %s5776_s28  ;;  %919 = vmatprep.subr.mxu1 %v883_v51 }
 0x266   : > { %920 = vmatpush1.msra.mxu1 %v882_v36 }
 0x267   : > { %v991_v47 = vpop.permute.xlu0 %990  ;;  %4263 = vmatmul.mubr.msk.f32.vlgmr.msra.gmra.mxu1 %vm462_vm3, %v758_v46  ;;  %v4289_v46 = vld [vmem:[%s5722_s5 + $0x50] sm:$0xff] }
 0x268   : > { %v996_v62 = vsel %vm994_vm14, %v991_v47, %v5313_v49  ;;  %1066 = vmatprep.mubr.f32.mxu1 %v4577_v34 }
 0x269   : > { %3170 = vrot.lane.b32.xlu0 %v3160_v1, %s5777_s17  ;;  %1032 = vmatprep.subr.mxu1 %v996_v62  ;;  %s4176_s17 = scalar_lea.sflag [#allocation4], %s323_s16 }
 0x26b   : > { %v989_v56 = vpop.permute.xlu0 %988 }
 0x26c   : > { %v995_v57 = vsel %vm994_vm14, %v989_v56, %v991_v47  ;;  %vm2714_vm14 = vcmask 891904  }
 0x26d   : > { %3282 = vrot.lane.b32.xlu0 %v3273_v5, %s5764_s21  ;;  %1033 = vmatpush1.msra.mxu1 %v995_v57  ;;  %v4295_v57 = vld [vmem:[%s5722_s5 + $0x60] sm:$0xff] }
 0x26e   : > { %4266 = vmatmul.mubr.msk.f32.vlgmr.msra.gmra.mxu1 %vm462_vm3, %v4265_v2 }
 0x26f   : > { %v1108_v49 = vpop.permute.xlu0 %1107  ;;  %1181 = vmatprep.mubr.f32.mxu1 %v4577_v34 }
 0x270   : > { %v1111_v13 = vsel %vm1109_vm2, %v5319_v55, %v1108_v49  ;;  %v5459_v55 = vpop.permute.xlu1 %2019  ;;  %vm2829_vm2 = vcmask 957440  }
 0x271   : > { %3280 = vrot.lane.b32.xlu0 %v3272_v17, %s5764_s21  ;;  %1147 = vmatprep.subr.mxu1 %v1111_v13  ;;  %s5778_s21 = smov 27   ;;  %v2026_v62 = vsel %vm2025_vm9, %v5459_v55, %v5441_v4  ;;  %v4301_v55 = vld [vmem:[%s5722_s5 + $0x70] sm:$0xff] }
 0x272   : > { %1148 = vmatpush1.msra.mxu1 %v1110_v8 }
 0x273   : > { %v1220_v25 = vpop.permute.xlu0 %1219  ;;  %4269 = vmatmul.mubr.msk.f32.vlgmr.msra.gmra.mxu1 %vm462_vm3, %v4268_v6  ;;  %v4298_v6 = vld [vmem:[%s5722_s5 + $0x68] sm:$0xff] }
 0x274   : > { %v1225_v41 = vsel %vm1223_vm1, %v1220_v25, %v5333_v9  ;;  %1295 = vmatprep.mubr.f32.mxu1 %v4577_v34  ;;  %v5471_v9 = vpop.permute.xlu1 %2138 }
 0x275   : > { %3398 = vrot.lane.b32.xlu0 %v3388_v7, %s5778_s21  ;;  %1261 = vmatprep.subr.mxu1 %v1225_v41 }
 0x277   : > { %v1218_v18 = vpop.permute.xlu0 %1217 }
 0x278   : > { %v1224_v59 = vsel %vm1223_vm1, %v1218_v18, %v1220_v25  ;;  %v5488_v26 = vpop.permute.xlu1 %2250 }
 0x279   : > { %3511 = vrot.lane.b32.xlu0 %v3502_v61, %s4620_s26  ;;  %1262 = vmatpush1.msra.mxu1 %v1224_v59 }
 0x27a   : > { %4272 = vmatmul.mubr.msk.f32.vlgmr.msra.gmra.mxu1 %vm462_vm3, %v4271_v32 }
 0x27b   : > { %v1337_v27 = vpop.permute.xlu0 %1336  ;;  %1410 = vmatprep.mubr.f32.mxu1 %v4577_v34 }
 0x27c   : > { %v1340_v23 = vsel %vm1338_vm4, %v5341_v12, %v1337_v27  ;;  %v5499_v11 = vpop.permute.xlu1 %2248  ;;  %vm3172_vm4 = vcmask 302080  }
 0x27d   : > { %3509 = vrot.lane.b32.xlu0 %v3501_v52, %s4620_s26  ;;  %1376 = vmatprep.subr.mxu1 %v1340_v23  ;;  %v2254_v8 = vsel %vm1223_vm1, %v5499_v11, %v5488_v26  ;;  %v4304_v52 = vld [vmem:[%s5722_s5 + $0x78] sm:$0xff] }
 0x27e   : > { %1377 = vmatpush1.msra.mxu1 %v1339_v31  ;;  %v4307_v31 = vld [vmem:[%s5722_s5 + $0x80] sm:$0xff] }
 0x27f   : > { %v1450_v50 = vpop.permute.xlu0 %1449  ;;  %4275 = vmatmul.mubr.msk.f32.vlgmr.msra.gmra.mxu1 %vm462_vm3, %v4274_v30 }
 0x280   : > { %v1455_v42 = vsel %vm1453_vm6, %v1450_v50, %v5356_v22  ;;  %1639 = vmatprep.mubr.f32.mxu1 %v4577_v34  ;;  %v3729_v22 = vmul.f32 %v5290_v38, %v5000_v54  ;;  %v2367_v35 = vpop.permute.xlu1 %2366 }
 0x281   : > { %3627 = vrot.lane.b32.xlu0 %v3617_v24, %s5759_s25  ;;  %1491 = vmatprep.subr.mxu0 %v1455_v42  ;;  %s4253_s25 = sshll.u32 %s323_s16, 4 }
 0x282   : > { %s325_s28 = scalar_lea.vmem [#allocation3], %s4253_s25 }
 0x283   : > { %v1448_v12 = vpop.permute.xlu0 %1447  ;;  %s4190_s21 = sshll.u32 %s325_s28, 4  ;;  %s4191_s21 = int_to_ptr.vmem [resolvable:$true] %s4190_s21 }
 0x284   : > { %v1454_v0 = vsel %vm1453_vm6, %v1448_v12, %v1450_v50  ;;  %v5518_v63 = vpop.permute.xlu1 %2482  ;;  %s4515_s29 = scalar_lea.vmem %s4191_s21, 256 }
 0x285   : > { %3739 = vrot.lane.b32.xlu0 %v3730_v28, %s4621_s14  ;;  %1492 = vmatpush1.msra.mxu0 %v1454_v0  ;;  %v4310_v28 = vld [vmem:[%s5722_s5 + $0x88] sm:$0xff]  ;;  %p4516_p11 = scmp.ne.s32.totalorder %s4191_s21, %s4515_s29 }
 0x286   : > { %4278 = vmatmul.mubr.msk.f32.vlgmr.msra.gmra.mxu0 %vm462_vm3, %v4277_v15 }
 0x287   : > { %v1567_v10 = vpop.permute.xlu0 %1566  ;;  %1754 = vmatprep.mubr.f32.mxu0 %v4577_v34  ;;  %p4517_p12 = pnand %p4516_p11, %p4714_p5 }
 0x288   : > { %v1569_v60 = vsel %vm546_vm13, %v5364_v19, %v1567_v10  ;;  %vm1797_vm13 = vcmask 678912   ;;  %v2481_v37 = vpop.permute.xlu1 %2480  ;;  %v4313_v10 = vld [vmem:[%s5722_s5 + $0x90] sm:$0xff] }
 0x289   : > { %3737 = vrot.lane.b32.xlu0 %v3729_v22, %s4621_s14  ;;  %1605 = vmatprep.subr.mxu1 %v1569_v60  ;;  %v1798_v39 = vsel %vm1797_vm13, %v5415_v44, %v5400_v29  ;;  %p4518_p13 = pneg %p4517_p12 }
 0x28a   : > { %1606 = vmatpush1.msra.mxu1 %v1568_v45 }
 0x28b   : > { %v1679_v54 = vpop.permute.xlu0 %1678  ;;  %4281 = vmatmul.mubr.msk.f32.vlgmr.msra.gmra.mxu1 %vm462_vm3, %v4280_v14 }
 0x28c   : > { %v1684_v38 = vsel %vm1682_vm8, %v1679_v54, %v5384_v3  ;;  %1869 = vmatprep.mubr.f32.mxu1 %v4577_v34 }
 0x28d   : > { %1720 = vmatprep.subr.mxu0 %v1684_v38  ;;  %v4316_v38 = vld [vmem:[%s5722_s5 + $0x98] sm:$0xff] }
 0x28f   : > { %v1677_v20 = vpop.permute.xlu0 %1676 }
 0x290   : > { %v1683_v19 = vsel %vm1682_vm8, %v1677_v20, %v1679_v54 }
 0x291   : > { %1721 = vmatpush1.msra.mxu0 %v1683_v19 }
 0x292   : > { %4284 = vmatmul.mubr.msk.f32.vlgmr.msra.gmra.mxu0 %vm462_vm3, %v4283_v21 }
 0x293   : > { %v1796_v48 = vpop.permute.xlu0 %1795  ;;  %1982 = vmatprep.mubr.f32.mxu0 %v4577_v34 }
 0x294   : > { %v1799_v3 = vsel %vm1797_vm13, %v5400_v29, %v1796_v48  ;;  %v2599_v29 = vpop.permute.xlu1 %2598  ;;  %v4319_v48 = vld [vmem:[%s5722_s5 + $0xa0] sm:$0xff] }
 0x295   : > { %1835 = vmatprep.subr.mxu1 %v1799_v3 }
 0x296   : > { %1836 = vmatpush1.msra.mxu1 %v1798_v39 }
 0x297   : > { %v1908_v58 = vpop.permute.xlu0 %1907  ;;  %4287 = vmatmul.mubr.msk.f32.vlgmr.msra.gmra.mxu1 %vm462_vm3, %v4286_v33 }
 0x298   : > { %v1912_v36 = vsel %vm774_vm0, %v1908_v58, %v5431_v53  ;;  %2097 = vmatprep.mubr.f32.mxu1 %v4577_v34  ;;  %v2711_v56 = vpop.permute.xlu1 %2710 }
 0x299   : > { %1948 = vmatprep.subr.mxu0 %v1912_v36  ;;  %v4322_v36 = vld [vmem:[%s5722_s5 + $0xa8] sm:$0xff] }
 0x29b   : > { %v1906_v51 = vpop.permute.xlu0 %1905 }
 0x29c   : > { %v1911_v1 = vsel %vm774_vm0, %v1906_v51, %v1908_v58  ;;  %v2709_v49 = vpop.permute.xlu1 %2708 }
 0x29d   : > { %1949 = vmatpush1.msra.mxu0 %v1911_v1  ;;  %v2715_v12 = vsel %vm2714_vm14, %v2709_v49, %v2711_v56 }
 0x29e   : > { %4290 = vmatmul.mubr.msk.f32.vlgmr.msra.gmra.mxu0 %vm462_vm3, %v4289_v46 }
 0x29f   : > { %v2024_v44 = vpop.permute.xlu0 %2023  ;;  %2212 = vmatprep.mubr.f32.mxu0 %v4577_v34 }
 0x2a0   : > { %v2027_v47 = vsel %vm2025_vm9, %v5441_v4, %v2024_v44  ;;  %v2828_v16 = vpop.permute.xlu1 %2827  ;;  %v4325_v44 = vld [vmem:[%s5722_s5 + $0xb0] sm:$0xff] }
 0x2a1   : > { %2063 = vmatprep.subr.mxu1 %v2027_v47 }
 0x2a2   : > { %2064 = vmatpush1.msra.mxu1 %v2026_v62 }
 0x2a3   : > { %v2137_v53 = vpop.permute.xlu0 %2136  ;;  %4293 = vmatmul.mubr.msk.f32.vlgmr.msra.gmra.mxu1 %vm462_vm3, %v4292_v43 }
 0x2a4   : > { %v2142_v5 = vsel %vm2140_vm10, %v2137_v53, %v5471_v9  ;;  %2325 = vmatprep.mubr.f32.mxu1 %v4577_v34  ;;  %v2940_v18 = vpop.permute.xlu1 %2939  ;;  %v2487_v9 = vsel %vm2486_vm12, %v2481_v37, %v5518_v63 }
 0x2a5   : > { %2178 = vmatprep.subr.mxu0 %v2142_v5  ;;  %v4328_v5 = vld [vmem:[%s5722_s5 + $0xb8] sm:$0xff] }
 0x2a7   : > { %v2135_v2 = vpop.permute.xlu0 %2134 }
 0x2a8   : > { %v2141_v17 = vsel %vm2140_vm10, %v2135_v2, %v2137_v53  ;;  %v2938_v30 = vpop.permute.xlu1 %2937 }
 0x2a9   : > { %2179 = vmatpush1.msra.mxu0 %v2141_v17 }
 0x2aa   : > { %4296 = vmatmul.mubr.msk.f32.vlgmr.msra.gmra.mxu0 %vm462_vm3, %v4295_v57 }
 0x2ab   : > { %v2253_v4 = vpop.permute.xlu0 %2252  ;;  %2440 = vmatprep.mubr.f32.mxu0 %v4577_v34 }
 0x2ac   : > { %v2255_v13 = vsel %vm1223_vm1, %v5488_v26, %v2253_v4  ;;  %v3056_v40 = vpop.permute.xlu1 %3055  ;;  %v4331_v4 = vld [vmem:[%s5722_s5 + $0xc0] sm:$0xff] }
 0x2ad   : > { %2291 = vmatprep.subr.mxu1 %v2255_v13 }
 0x2ae   : > { %2292 = vmatpush1.msra.mxu1 %v2254_v8 }
 0x2af   : > { %v2365_v7 = vpop.permute.xlu0 %2364  ;;  %4299 = vmatmul.mubr.msk.f32.vlgmr.msra.gmra.mxu1 %vm462_vm3, %v4298_v6 }
 0x2b0   : > { %v2370_v25 = vsel %vm2368_vm11, %v2365_v7, %v2367_v35  ;;  %2558 = vmatprep.mubr.f32.mxu1 %v4577_v34  ;;  %v3169_v22 = vpop.permute.xlu1 %3168  ;;  %v2943_v35 = vsel %vm1549_vm7, %v2938_v30, %v2940_v18 }
 0x2b1   : > { %2406 = vmatprep.subr.mxu0 %v2370_v25  ;;  %v4334_v25 = vld [vmem:[%s5722_s5 + $0xc8] sm:$0xff] }
 0x2b3   : > { %v2363_v41 = vpop.permute.xlu0 %2362 }
 0x2b4   : > { %v2369_v61 = vsel %vm2368_vm11, %v2363_v41, %v2365_v7  ;;  %v3167_v14 = vpop.permute.xlu1 %3166 }
 0x2b5   : > { %2407 = vmatpush1.msra.mxu0 %v2369_v61  ;;  %v3173_v37 = vsel %vm3172_vm4, %v3167_v14, %v3169_v22 }
 0x2b6   : > { %4302 = vmatmul.mubr.msk.f32.vlgmr.msra.gmra.mxu0 %vm462_vm3, %v4301_v55 }
 0x2b7   : > { %v2485_v32 = vpop.permute.xlu0 %2484  ;;  %2671 = vmatprep.mubr.f32.mxu0 %v4577_v34 }
 0x2b8   : > { %v2488_v59 = vsel %vm2486_vm12, %v5518_v63, %v2485_v32  ;;  %v3285_v19 = vpop.permute.xlu1 %3284  ;;  %v4337_v32 = vld [vmem:[%s5722_s5 + $0xd0] sm:$0xff] }
 0x2b9   : > { %2524 = vmatprep.subr.mxu1 %v2488_v59 }
 0x2ba   : > { %2525 = vmatpush1.msra.mxu1 %v2487_v9 }
 0x2bb   : > { %v2597_v27 = vpop.permute.xlu0 %2596  ;;  %4305 = vmatmul.mubr.msk.f32.vlgmr.msra.gmra.mxu1 %vm462_vm3, %v4304_v52  ;;  %v616_v52 = vpop.f32.mrf.mxu1 }
 0x2bc   : > { %v2601_v23 = vsel %vm1549_vm7, %v2597_v27, %v2599_v29  ;;  %2786 = vmatprep.mubr.f32.mxu1 %v4577_v34  ;;  %v3397_v33 = vpop.permute.xlu1 %3396 }
 0x2bd   : > { %2637 = vmatprep.subr.mxu0 %v2601_v23  ;;  %v618_v9 = vpop.f32.mrf.mxu1  ;;  %v5637_v23 = vld [vmem:[%s4759_s22] sm:$0xff] }
 0x2be   : > { %v700_v30 = vmul.f32 %v5637_v23, %v616_v52 }
 0x2bf   : > { %v2595_v24 = vpop.permute.xlu0 %2594 }
 0x2c0   : > { %v2600_v50 = vsel %vm1549_vm7, %v2595_v24, %v2597_v27  ;;  %v3395_v1 = vpop.permute.xlu1 %3394  ;;  %v5641_v24 = vld [vmem:[%s4759_s22 + $0x8] sm:$0xff]  ;;  %s4519_s22 = sshll.u32 %s4625_s13, 4  ;;  %s4520_s22 = int_to_ptr.vmem [resolvable:$false] %s4519_s22 }
 0x2c1   : > { %2638 = vmatpush1.msra.mxu0 %v2600_v50  ;;  %s4521_s26 = scalar_lea.vmem %s4520_s22, 512  ;;  %p4522_p0 = scmp.lt.s32.totalorder %s4191_s21, %s4520_s22 }
 0x2c2   : > { %4308 = vmatmul.mubr.msk.f32.vlgmr.msra.gmra.mxu0 %vm462_vm3, %v4307_v31  ;;  %v701_v31 = vmul.f32 %v5641_v24, %v618_v9  ;;  %p4523_p1 = scmp.lt.s32.totalorder %s4521_s26, %s4515_s29 }
 0x2c3   : > { %v2713_v42 = vpop.permute.xlu0 %2712  ;;  %2901 = vmatprep.mubr.f32.mxu0 %v4577_v34 }
 0x2c4   : > { %v2716_v26 = vsel %vm2714_vm14, %v2711_v56, %v2713_v42  ;;  %v3514_v43 = vpop.permute.xlu1 %3513  ;;  %p4524_p2 = por %p4523_p1, %p4522_p0 }
 0x2c5   : > { %2752 = vmatprep.subr.mxu1 %v2716_v26 }
 0x2c6   : > { %2753 = vmatpush1.msra.mxu1 %v2715_v12  ;;  %v4623_v12 = vmov 0   ;;  %p4525_p3 = pnand %p4524_p2, %p4518_p13 }
 0x2c7   : > { %v2826_v15 = vpop.permute.xlu0 %2825  ;;  %4311 = vmatmul.mubr.msk.f32.vlgmr.msra.gmra.mxu1 %vm462_vm3, %v4310_v28  ;;  %v4622_v28 = vmov 1   ;;  %4482 = vset.pattern.permute.xlu0 %v4623_v12 }
 0x2c8   : > { %v2831_v0 = vsel %vm2829_vm2, %v2826_v15, %v2828_v16  ;;  %3014 = vmatprep.mubr.f32.mxu1 %v4577_v34  ;;  %4483 = vset.pattern.permute.xlu1 %v4622_v28 }
 0x2c9   : > { %2867 = vmatprep.subr.mxu0 %v2831_v0  ;;  %v3626_v2 = vpop.permute.xlu1 %3625  ;;  %v4624_v0 = vmov 3  }
 0x2cb   : > { %v2824_v11 = vpop.permute.xlu0 %2823 }
 0x2cc   : > { %v2830_v60 = vsel %vm2829_vm2, %v2824_v11, %v2826_v15  ;;  %v5653_v15 = vld [vmem:[%s5725_s8] sm:$0xff] }
 0x2cd   : > { %2868 = vmatpush1.msra.mxu0 %v2830_v60  ;;  %v3624_v6 = vpop.permute.xlu1 %3623 }
 0x2ce   : > { %4314 = vmatmul.mubr.msk.f32.vlgmr.msra.gmra.mxu0 %vm462_vm3, %v4313_v10  ;;  %v3629_v16 = vsel %vm774_vm0, %v3624_v6, %v3626_v2 }
 0x2cf   : > { %v2942_v45 = vpop.permute.xlu0 %2941  ;;  %3129 = vmatprep.mubr.f32.mxu0 %v4577_v34 }
 0x2d0   : > { %v2944_v54 = vsel %vm1549_vm7, %v2940_v18, %v2942_v45  ;;  %vm3400_vm7 = vcmask 220160  }
 0x2d1   : > { %2980 = vmatprep.subr.mxu1 %v2944_v54  ;;  %v3401_v56 = vsel %vm3400_vm7, %v3395_v1, %v3397_v33 }
 0x2d2   : > { %2981 = vmatpush1.msra.mxu1 %v2943_v35 }
 0x2d3   : > { %v3054_v20 = vpop.permute.xlu0 %3053  ;;  %4317 = vmatmul.mubr.msk.f32.vlgmr.msra.gmra.mxu1 %vm462_vm3, %v4316_v38 }
 0x2d4   : > { %v3059_v21 = vsel %vm3057_vm15, %v3054_v20, %v3056_v40  ;;  %3244 = vmatprep.mubr.f32.mxu1 %v4577_v34  ;;  %v3742_v41 = vpop.permute.xlu1 %3741 }
 0x2d5   : > { %3095 = vmatprep.subr.mxu0 %v3059_v21 }
 0x2d7   : > { %v3052_v63 = vpop.permute.xlu0 %3051 }
 0x2d8   : > { %v3058_v3 = vsel %vm3057_vm15, %v3052_v63, %v3054_v20 }
 0x2d9   : > { %3096 = vmatpush1.msra.mxu0 %v3058_v3 }
 0x2da   : > { %4320 = vmatmul.mubr.msk.f32.vlgmr.msra.gmra.mxu0 %vm462_vm3, %v4319_v48 }
 0x2db   : > { %v3171_v39 = vpop.permute.xlu0 %3170  ;;  %3357 = vmatprep.mubr.f32.mxu0 %v4577_v34 }
 0x2dc   : > { %v3174_v58 = vsel %vm3172_vm4, %v3169_v22, %v3171_v39 }
 0x2dd   : > { %3210 = vmatprep.subr.mxu1 %v3174_v58 }
 0x2de   : > { %3211 = vmatpush1.msra.mxu1 %v3173_v37 }
 0x2df   : > { %v3283_v51 = vpop.permute.xlu0 %3282  ;;  %4323 = vmatmul.mubr.msk.f32.vlgmr.msra.gmra.mxu1 %vm462_vm3, %v4322_v36 }
 0x2e0   : > { %v3287_v46 = vsel %vm1223_vm1, %v3283_v51, %v3285_v19  ;;  %3472 = vmatprep.mubr.f32.mxu1 %v4577_v34 }
 0x2e1   : > { %3323 = vmatprep.subr.mxu0 %v3287_v46 }
 0x2e3   : > { %v3281_v29 = vpop.permute.xlu0 %3280 }
 0x2e4   : > { %v3286_v47 = vsel %vm1223_vm1, %v3281_v29, %v3283_v51  ;;  %vm3743_vm1 = vcmask 613376  }
 0x2e5   : > { %3324 = vmatpush1.msra.mxu0 %v3286_v47 }
 0x2e6   : > { %4326 = vmatmul.mubr.msk.f32.vlgmr.msra.gmra.mxu0 %vm462_vm3, %v4325_v44 }
 0x2e7   : > { %v3399_v62 = vpop.permute.xlu0 %3398  ;;  %3587 = vmatprep.mubr.f32.mxu0 %v4577_v34 }
 0x2e8   : > { %v3402_v53 = vsel %vm3400_vm7, %v3397_v33, %v3399_v62 }
 0x2e9   : > { %3438 = vmatprep.subr.mxu1 %v3402_v53 }
 0x2ea   : > { %3439 = vmatpush1.msra.mxu1 %v3401_v56 }
 0x2eb   : > { %v3512_v57 = vpop.permute.xlu0 %3511  ;;  %4329 = vmatmul.mubr.msk.f32.vlgmr.msra.gmra.mxu1 %vm462_vm3, %v4328_v5 }
 0x2ec   : > { %v3517_v17 = vsel %vm3515_vm5, %v3512_v57, %v3514_v43  ;;  %3700 = vmatprep.mubr.f32.mxu1 %v4577_v34 }
 0x2ed   : > { %3553 = vmatprep.subr.mxu0 %v3517_v17 }
 0x2ef   : > { %v3510_v49 = vpop.permute.xlu0 %3509 }
 0x2f0   : > { %v3516_v13 = vsel %vm3515_vm5, %v3510_v49, %v3512_v57 }
 0x2f1   : > { %3554 = vmatpush1.msra.mxu0 %v3516_v13 }
 0x2f2   : > { %4332 = vmatmul.mubr.msk.f32.vlgmr.msra.gmra.mxu0 %vm462_vm3, %v4331_v4 }
 0x2f3   : > { %v3628_v8 = vpop.permute.xlu0 %3627  ;;  %3815 = vmatprep.mubr.f32.mxu0 %v4577_v34 }
 0x2f4   : > { %v3630_v7 = vsel %vm774_vm0, %v3626_v2, %v3628_v8 }
 0x2f5   : > { %3666 = vmatprep.subr.mxu1 %v3630_v7 }
 0x2f6   : > { %3667 = vmatpush1.msra.mxu1 %v3629_v16 }
 0x2f7   : > { %v3740_v55 = vpop.permute.xlu0 %3739  ;;  %4335 = vmatmul.mubr.msk.f32.vlgmr.msra.gmra.mxu1 %vm462_vm3, %v4334_v25 }
 0x2f8   : > { %v3745_v61 = vsel %vm3743_vm1, %v3740_v55, %v3742_v41  ;;  %3927 = vmatprep.mubr.f32.mxu1 %v4577_v34 }
 0x2f9   : > { %3781 = vmatprep.subr.mxu0 %v3745_v61 }
 0x2fb   : > { %v3738_v18 = vpop.permute.xlu0 %3737 }
 0x2fc   : > { %v3744_v59 = vsel %vm3743_vm1, %v3738_v18, %v3740_v55 }
 0x2fd   : > { %3782 = vmatpush1.msra.mxu0 %v3744_v59 }
 0x2fe   : > { %4338 = vmatmul.mubr.msk.f32.vlgmr.msra.gmra.mxu0 %vm462_vm3, %v4337_v32 }
 0x2ff   : > { %4000 = vmatprep.mubr.f32.mxu0 %v4577_v34 }
 0x310   : > { %v695_v27 = vpop.f32.mrf.mxu1 }
 0x311   : > { %v5644_v40 = vmul.f32 %v700_v30, %v695_v27 }
 0x312   : > { %v697_v50 = vpop.f32.mrf.mxu1 }
 0x313   : > { %v5646_v42 = vmul.f32 %v701_v31, %v697_v50 }
 0x315   : > { %v704_v26 = vadd.f32 %v5646_v42, %v5644_v40 }
 0x317   : > { %705 = vadd.xlane.f32.xlu1 %v704_v26 }
 0x31e   : > { %v867_v22 = vpop.f32.mrf.mxu1 }
 0x320   : > { %v869_v11 = vpop.f32.mrf.mxu1 }
 0x327   : > { %v955_v10 = vpop.f32.mrf.mxu1 }
 0x328   : > { %728 = vperm.xlu1 %4483, %v5653_v15   ;;  %v956_v35 = vadd.f32 %v955_v10, %v867_v22 }
 0x329   : > { %v957_v60 = vpop.f32.mrf.mxu1 }
 0x32a   : > { %v958_v20 = vadd.f32 %v957_v60, %v869_v11 }
 0x32c   : > { %4484 = vset.pattern.permute.xlu1 %v4624_v0 }
 0x32d   : > { %3825 = vperm.xlu1 %4484, %v5653_v15  }
 0x32e   : > { %v1068_v14 = vpop.f32.mrf.mxu1 }
 0x32f   : > { %v1073_v19 = vadd.f32 %v1068_v14, %v956_v35 }
 0x330   : > { %v1070_v45 = vpop.f32.mrf.mxu1 }
 0x331   : > { %v1074_v63 = vadd.f32 %v1070_v45, %v958_v20 }
 0x333   : > { %v1183_v54 = vpop.f32.mrf.mxu1 }
 0x334   : > { %v1188_v3 = vadd.f32 %v1183_v54, %v1073_v19 }
 0x335   : > { %v1185_v38 = vpop.f32.mrf.mxu1 }
 0x336   : > { %v1189_v33 = vadd.f32 %v1185_v38, %v1074_v63 }
 0x33a   : > { %v1297_v21 = vpop.f32.mrf.mxu1 }
 0x33b   : > { %v1302_v58 = vadd.f32 %v1297_v21, %v1188_v3 }
 0x33c   : > { %v1299_v48 = vpop.f32.mrf.mxu1 }
 0x33d   : > { %v1303_v36 = vadd.f32 %v1299_v48, %v1189_v33 }
 0x33f   : > { %v1412_v39 = vpop.f32.mrf.mxu1 }
 0x340   : > { %v1417_v46 = vadd.f32 %v1412_v39, %v1302_v58 }
 0x341   : > { %v1414_v37 = vpop.f32.mrf.mxu1 }
 0x342   : > { %v1418_v1 = vadd.f32 %v1414_v37, %v1303_v36 }
 0x346   : > { %v1527_v51 = vpop.f32.mrf.mxu0 }
 0x347   : > { %v1532_v47 = vadd.f32 %v1527_v51, %v1417_v46 }
 0x348   : > { %v1529_v29 = vpop.f32.mrf.mxu0 }
 0x349   : > { %v1533_v43 = vadd.f32 %v1529_v29, %v1418_v1 }
 0x34b   : > { %v1641_v44 = vpop.f32.mrf.mxu1 }
 0x34c   : > { %v1646_v5 = vadd.f32 %v1641_v44, %v1532_v47 }
 0x34d   : > { %v1643_v62 = vpop.f32.mrf.mxu1 }
 0x34e   : > { %v1647_v56 = vadd.f32 %v1643_v62, %v1533_v43 }
 0x352   : > { %v1756_v53 = vpop.f32.mrf.mxu0 }
 0x353   : > { %v1761_v17 = vadd.f32 %v1756_v53, %v1646_v5 }
 0x354   : > { %v1758_v2 = vpop.f32.mrf.mxu0 }
 0x355   : > { %v1762_v49 = vadd.f32 %v1758_v2, %v1647_v56 }
 0x357   : > { %v1871_v57 = vpop.f32.mrf.mxu1 }
 0x358   : > { %v1876_v6 = vadd.f32 %v1871_v57, %v1761_v17 }
 0x359   : > { %v1873_v4 = vpop.f32.mrf.mxu1 }
 0x35a   : > { %v1877_v8 = vadd.f32 %v1873_v4, %v1762_v49 }
 0x35e   : > { %v1984_v13 = vpop.f32.mrf.mxu0 }
 0x35f   : > { %v1989_v16 = vadd.f32 %v1984_v13, %v1876_v6 }
 0x360   : > { %v1986_v7 = vpop.f32.mrf.mxu0 }
 0x361   : > { %v1990_v41 = vadd.f32 %v1986_v7, %v1877_v8 }
 0x363   : > { %v2099_v25 = vpop.f32.mrf.mxu1 }
 0x364   : > { %v2104_v18 = vadd.f32 %v2099_v25, %v1989_v16 }
 0x365   : > { %v2101_v55 = vpop.f32.mrf.mxu1 }
 0x366   : > { %v2105_v32 = vadd.f32 %v2101_v55, %v1990_v41 }
 0x36a   : > { %v2214_v61 = vpop.f32.mrf.mxu0 }
 0x36b   : > { %v2219_v9 = vadd.f32 %v2214_v61, %v2104_v18 }
 0x36c   : > { %v2216_v59 = vpop.f32.mrf.mxu0 }
 0x36d   : > { %v2220_v27 = vadd.f32 %v2216_v59, %v2105_v32 }
 0x36f   : > { %v2327_v52 = vpop.f32.mrf.mxu1 }
 0x370   : > { %v2332_v50 = vadd.f32 %v2327_v52, %v2219_v9 }
 0x371   : > { %v2329_v30 = vpop.f32.mrf.mxu1 }
 0x372   : > { %v2333_v26 = vadd.f32 %v2329_v30, %v2220_v27 }
 0x376   : > { %v2442_v31 = vpop.f32.mrf.mxu0 }
 0x377   : > { %v2447_v10 = vadd.f32 %v2442_v31, %v2332_v50 }
 0x378   : > { %v2444_v28 = vpop.f32.mrf.mxu0 }
 0x379   : > { %v2448_v60 = vadd.f32 %v2444_v28, %v2333_v26 }
 0x37b   : > { %v2560_v12 = vpop.f32.mrf.mxu1 }
 0x37c   : > { %v2565_v21 = vadd.f32 %v2560_v12, %v2447_v10 }
 0x37d   : > { %v2562_v54 = vpop.f32.mrf.mxu1 }
 0x37e   : > { %v2566_v19 = vadd.f32 %v2562_v54, %v2448_v60 }
 0x382   : > { %v2673_v38 = vpop.f32.mrf.mxu0 }
 0x383   : > { %v2678_v33 = vadd.f32 %v2673_v38, %v2565_v21 }
 0x384   : > { %v2675_v48 = vpop.f32.mrf.mxu0 }
 0x387   : > { %v2788_v3 = vpop.f32.mrf.mxu1 }
 0x389   : > { %v2790_v39 = vpop.f32.mrf.mxu1 }
 0x38e   : > { %v2903_v58 = vpop.f32.mrf.mxu0 }
 0x390   : > { %v2905_v37 = vpop.f32.mrf.mxu0 }
 0x393   : > { %v3016_v51 = vpop.f32.mrf.mxu1 }
 0x395   : > { %v3018_v29 = vpop.f32.mrf.mxu1 }
 0x39a   : > { %v3131_v44 = vpop.f32.mrf.mxu0 }
 0x39c   : > { %v3133_v62 = vpop.f32.mrf.mxu0 }
 0x39f   : > { %v3246_v53 = vpop.f32.mrf.mxu1 }
 0x3a0   : > { %v706_v22 = vpop.xlane.xlu1 %705 }
 0x3a1   : > { %v708_v11 = vmul.f32 0.00390625, %v706_v22  ;;  %v3248_v2 = vpop.f32.mrf.mxu1 }
 0x3a3   : > { %v5659_v14 = vsub.f32 %v5644_v40, %v708_v11  ;;  %v5662_v45 = vsub.f32 %v5646_v42, %v708_v11  ;;  %v2679_v40 = vadd.f32 %v2675_v48, %v2566_v19  ;;  %v2793_v42 = vadd.f32 %v2788_v3, %v2678_v33 }
 0x3a4   : > { %v729_v9 = vpop.permute.xlu1 %728 }
 0x3a5   : > { %v711_v35 = vmul.f32 %v5659_v14, %v5659_v14  ;;  %v712_v20 = vmul.f32 %v5662_v45, %v5662_v45  ;;  %v2794_v36 = vadd.f32 %v2790_v39, %v2679_v40  ;;  %v2908_v46 = vadd.f32 %v2903_v58, %v2793_v42 }
 0x3a6   : > { %v3359_v57 = vpop.f32.mrf.mxu0 }
 0x3a7   : > { %v713_v63 = vadd.f32 %v712_v20, %v711_v35  ;;  %v2909_v1 = vadd.f32 %v2905_v37, %v2794_v36  ;;  %v3021_v47 = vadd.f32 %v3016_v51, %v2908_v46 }
 0x3a8   : > { %v3361_v4 = vpop.f32.mrf.mxu0  ;;  %v3826_v26 = vpop.permute.xlu1 %3825 }
 0x3a9   : > { %714 = vadd.xlane.f32.xlu0 %v713_v63  ;;  %v3022_v43 = vadd.f32 %v3018_v29, %v2909_v1  ;;  %v3136_v5 = vadd.f32 %v3131_v44, %v3021_v47 }
 0x3ab   : > { %v3137_v56 = vadd.f32 %v3133_v62, %v3022_v43  ;;  %v3251_v17 = vadd.f32 %v3246_v53, %v3136_v5  ;;  %v3474_v13 = vpop.f32.mrf.mxu1 }
 0x3ad   : > { %v3252_v49 = vadd.f32 %v3248_v2, %v3137_v56  ;;  %v3364_v6 = vadd.f32 %v3359_v57, %v3251_v17  ;;  %v3476_v7 = vpop.f32.mrf.mxu1 }
 0x3af   : > { %v3365_v8 = vadd.f32 %v3361_v4, %v3252_v49  ;;  %v3479_v16 = vadd.f32 %v3474_v13, %v3364_v6  ;;  %v3857_v6 = vld [vmem:[%s5723_s6] sm:$0xff] }
 0x3b1   : > { %v3480_v41 = vadd.f32 %v3476_v7, %v3365_v8 }
 0x3b2   : > { %v3589_v25 = vpop.f32.mrf.mxu0 }
 0x3b3   : > { %v3594_v18 = vadd.f32 %v3589_v25, %v3479_v16 }
 0x3b4   : > { %v3591_v55 = vpop.f32.mrf.mxu0 }
 0x3b5   : > { %v3595_v32 = vadd.f32 %v3591_v55, %v3480_v41 }
 0x3b7   : > { %v3702_v61 = vpop.f32.mrf.mxu1 }
 0x3b8   : > { %v3707_v27 = vadd.f32 %v3702_v61, %v3594_v18 }
 0x3b9   : > { %v3704_v59 = vpop.f32.mrf.mxu1 }
 0x3ba   : > { %v3708_v30 = vadd.f32 %v3704_v59, %v3595_v32 }
 0x3be   : > { %v3817_v52 = vpop.f32.mrf.mxu0 }
 0x3bf   : > { %722 = vperm.xlu0 %4482, %v5653_v15   ;;  %v3822_v31 = vadd.f32 %v3817_v52, %v3707_v27 }
 0x3c0   : > { %v3819_v15 = vpop.f32.mrf.mxu0 }
 0x3c1   : > { %v3823_v50 = vadd.f32 %v3819_v15, %v3708_v30  ;;  %v3828_v28 = vadd.f32 %v3826_v26, %v3822_v31 }
 0x3c3   : > { %4485 = vset.pattern.permute.xlu0 %v4624_v0  ;;  %v3829_v12 = vadd.f32 %v3826_v26, %v3823_v50 }
 0x3c5   : > { %v3834_v22 = vadd.f32 %v3829_v12, %v3828_v28 }
 0x3de   : > { %3835 = vadd.xlane.f32.xlu0 %v3834_v22 }
 0x432   : > { %v715_v0 = vpop.xlane.xlu0 %714 }
 0x433   : > { %v716_v11 = vmul.f32 0.00390625, %v715_v0 }
 0x435   : > { %v717_v10 = vadd.f32 1e-05, %v716_v11 }
 0x437   : > { %4490 = vrsqrt.f32 %v717_v10 }
 0x43a   : > { %v723_v54 = vpop.permute.xlu0 %722 }
 0x444   : > { %v4491_v60 = vpop.eup %4490 }
 0x445   : > { %v719_v38 = vmul.f32 %v4491_v60, %v5659_v14  ;;  %v720_v35 = vmul.f32 %v4491_v60, %v5662_v45 }
 0x447   : > { %v725_v20 = vmul.f32 %v723_v54, %v719_v38  ;;  %v726_v21 = vmul.f32 %v723_v54, %v720_v35 }
 0x449   : > { %v731_v19 = vadd.f32 %v729_v9, %v725_v20  ;;  %v732_v63 = vadd.f32 %v729_v9, %v726_v21 }
 0x44b   : > { %v3830_v48 = vadd.f32 %v732_v63, %v731_v19 }
 0x44d   : > { %3831 = vadd.xlane.f32.xlu1 %v3830_v48 }
 0x467   : > { %v3836_v3 = vpop.xlane.xlu0 %3835 }
 0x468   : > { %v3837_v33 = vmul.f32 0.00390625, %v3836_v3 }
 0x46a   : > { %v3844_v40 = vrot.slane %v3837_v33, 4 }
 0x46c   : > { %v3845_v39 = vmax.f32 %v3837_v33, %v3844_v40 }
 0x46e   : > { %v3846_v42 = vrot.slane %v3845_v39, 2 }
 0x470   : > { %v3847_v51 = vmax.f32 %v3845_v39, %v3846_v42 }
 0x472   : > { %v3848_v14 = vrot.slane %v3847_v51, 1 }
 0x474   : > { %v3849_v44 = vmax.f32 %v3847_v51, %v3848_v14 }
 0x4d6   : > { %v3832_v58 = vpop.xlane.xlu1 %3831 }
 0x4d7   : > { %v3833_v36 = vmul.f32 0.00390625, %v3832_v58 }
 0x4d9   : > { %v3838_v37 = vrot.slane %v3833_v36, 4 }
 0x4db   : > { %v3839_v46 = vmax.f32 %v3833_v36, %v3838_v37 }
 0x4dd   : > { %v3840_v1 = vrot.slane %v3839_v46, 2 }
 0x4df   : > { %v3841_v29 = vmax.f32 %v3839_v46, %v3840_v1 }
 0x4e1   : > { %v3842_v45 = vrot.slane %v3841_v29, 1 }
 0x4e3   : > { %v3843_v47 = vmax.f32 %v3841_v29, %v3842_v45 }
 0x4e5   : > { %v3850_v43 = vmax.f32 %v3843_v47, %v3849_v44 }
 0x4e7   : > { %v3851_v62 = vsub.f32 %v3833_v36, %v3850_v43  ;;  %v3854_v53 = vsub.f32 %v3837_v33, %v3850_v43 }
 0x4e9   : > { %v3852_v5 = vmul.f32 1.442695, %v3851_v62  ;;  %v3855_v56 = vmul.f32 1.442695, %v3854_v53 }
 0x4eb   : > { %4492 = vpow2.f32 %v3852_v5 }
 0x4ec   : > { %4494 = vpow2.f32 %v3855_v56 }
 0x4f8   : > { %v4493_v2 = vpop.eup %4492 }
 0x4f9   : > { %v4495_v57 = vpop.eup %4494  ;;  %v3859_v17 = vmul.f32 %v4493_v2, %v3829_v12  ;;  %v3858_v49 = vmul.f32 %v4493_v2, %v3828_v28 }
 0x4fa   : > { %v3935_v4 = vmul.f32 %v4495_v57, %v732_v63  ;;  %v3934_v13 = vmul.f32 %v4495_v57, %v731_v19 }
 0x4fb   : > { %3893 = vmatprep.subr.mxu1 %v3859_v17 }
 0x4fc   : > { %3966 = vmatprep.subr.mxu0 %v3935_v4  ;;  %3894 = vmatpush1.msra.mxu1 %v3858_v49 }
 0x4fd   : > { %3967 = vmatpush1.msra.mxu0 %v3934_v13  ;;  %4339 = vmatmul.mubr.msk.f32.vlgmr.msra.gmra.mxu1 %vm462_vm3, %v3857_v6 }
 0x4fe   : > { %4340 = vmatmul.mubr.msk.f32.vlgmr.msra.gmra.mxu0 %vm462_vm3, %v3857_v6  ;;  %4037 = vmatprep.subr.mxu1 %v4493_v2 }
 0x4ff   : > { %4108 = vmatprep.subr.mxu0 %v4495_v57  ;;  %4038 = vmatpush1.msra.mxu1 %v4493_v2 }
 0x500   : > { %4109 = vmatpush1.msra.mxu0 %v4495_v57  ;;  %4071 = vmatprep.mubr.f32.mxu1 %v4577_v34 }
 0x501   : > { %4142 = vmatprep.mubr.f32.mxu0 %v4577_v34  ;;  %4341 = vmatmul.mubr.msk.f32.vlgmr.msra.gmra.mxu1 %vm462_vm3, %v3857_v6 }
 0x502   : > { %4342 = vmatmul.mubr.msk.f32.vlgmr.msra.gmra.mxu0 %vm462_vm3, %v3857_v6 }
 0x5bd   : > { %v3929_v8 = vpop.f32.mrf.mxu1 }
 0x5be   : > { %v4002_v7 = vpop.f32.mrf.mxu0 }
 0x5bf   : > { %v3931_v25 = vpop.f32.mrf.mxu1 }
 0x5c0   : > { %v4004_v16 = vpop.f32.mrf.mxu0 }
 0x5c1   : > { %v4073_v41 = vpop.f32.mrf.mxu1 }
 0x5c2   : > { %4496 = vrcp.f32 %v4073_v41  ;;  %v4144_v55 = vpop.f32.mrf.mxu0 }
 0x5c3   : > { %4498 = vrcp.f32 %v4144_v55  ;;  %v4075_v61 = vpop.f32.mrf.mxu1 }
 0x5c4   : > { %4500 = vrcp.f32 %v4075_v61  ;;  %v4146_v18 = vpop.f32.mrf.mxu0 }
 0x5c5   : > { %4502 = vrcp.f32 %v4146_v18 }
 0x5cf   : > { %v4497_v32 = vpop.eup %4496 }
 0x5d0   : > { %v4499_v59 = vpop.eup %4498  ;;  %v4151_v52 = vmul.f32 %v4497_v32, %v3929_v8 }
 0x5d1   : > { %v4501_v34 = vpop.eup %4500  ;;  %v4155_v9 = vmul.f32 %v4499_v59, %v4002_v7 }
 0x5d2   : > { %v4503_v27 = vpop.eup %4502  ;;  %v4152_v30 = vmul.f32 %v4501_v34, %v3931_v25 }
 0x5d3   : > { %v4157_v15 = vadd.f32 %v4155_v9, %v4151_v52  ;;  %v4156_v31 = vmul.f32 %v4503_v27, %v4004_v16 }
 0x5d5   : > { %v4343_v50 = vmul.f32 -1.442695, %v4157_v15  ;;  %v4158_v26 = vadd.f32 %v4156_v31, %v4152_v30 }
 0x5d7   : > { %4504 = vpow2.f32 %v4343_v50  ;;  %v4344_v28 = vmul.f32 -1.442695, %v4158_v26 }
 0x5d9   : > { %4506 = vpow2.f32 %v4344_v28 }
 0x5e4   : > { %v4505_v12 = vpop.eup %4504 }
 0x5e5   : > { %v4165_v22 = vadd.f32 1.0, %v4505_v12 }
 0x5e6   : > { %v4507_v0 = vpop.eup %4506 }
 0x5e7   : > { %4508 = vrcp.f32 %v4165_v22  ;;  %v4166_v11 = vadd.f32 1.0, %v4507_v0 }
 0x5e9   : > { %4510 = vrcp.f32 %v4166_v11 }
 0x5f4   : > { %v4509_v10 = vpop.eup %4508 }
 0x5f5   : > { %v4171_v60 = vmul.f32 %v5637_v23, %v4509_v10 }
 0x5f6   : > { %v4511_v54 = vpop.eup %4510 }
 0x5f7   : > { %v4172_v38 = vmul.f32 %v5641_v24, %v4511_v54  ;;  %4173 = vst [vmem:[%s325_s28] sm:$0xff] %v4171_v60 }
 0x5f9   : > { %4174 = vst [vmem:[%s325_s28 + $0x8] sm:$0xff] %v4172_v38 }
 0x5fa   : > { %4528 = shalt.err (!%p4525_p3)
}
 0x5fb   : > { %s4529_s25 = scalar_lea.hbm %s4188_s27, 256  ;;  %s4533_s28 = scalar_lea.hbm %s5726_s9, 512 }
 0x5fc   : > { %p4530_p4 = scmp.ne.s32.totalorder %s4188_s27, %s4529_s25  ;;  %p4534_p9 = scmp.lt.s32.totalorder %s4188_s27, %s5726_s9 }
 0x5fd   : > { %p4535_p10 = scmp.lt.s32.totalorder %s4533_s28, %s4529_s25 }
 0x5fe   : > { %p4531_p7 = pnand %p4530_p4, %p4714_p5 }
 0x5ff   : > { %p4536_p11 = por %p4535_p10, %p4534_p9 }
 0x600   : > { %p4532_p8 = pneg %p4531_p7 }
 0x602   : > { %p4537_p12 = pnand %p4536_p11, %p4532_p8 }
 0x604   : > { %4540 = shalt.err (!%p4537_p12)
}
 0x605   : > { %4394 = dma.vmem_to_hbm [thread:$0]  (%p4714_p5), %s4191_s21, 256, %s4188_s27, %s4176_s17  }
 0x606 PF: > { %p4400_p13 = scmp.ge.s32.totalorder %s4575_s12, 2  ;;  %s4202_s29 = sand.u32 1, %s4563_s30  }
 0x607   : > { %s4203_s13 = scalar_lea.sflag [#allocation4], %s4202_s29 }
 0x608   : > { %p4397_p0 = pnand %p4400_p13, %p4718_p6 }
 0x60a   : > { %p4398_p1 = pneg %p4397_p0 }
 0x60c   : > { %4558 = dma.done.wait (%p4398_p1), %s4203_s13, 256  }
 0x60d   : > { %4560 = vsyncadd (%p4398_p1), %s4203_s13, 4294967040  ;;  %p19_p2 = scmp.ge.s32.totalorder %s4701_s15, 4   ;;  %s5779_s30 = smov %s4567_s10 }
 0x60e   : > { %s5780_s10 = smov %s4571_s11  ;;  %s5781_s11 = smov %s4712_s18 }
 0x60f   : > { %s5782_s12 = smov %s4701_s15  ;;  %21 = sbr.rel (!%p19_p2) target bundleno = 3 (0x3), region = 143 }
 0x614   :  { %4208 = vsyncpa [#allocation4], 1 }
 0x615   :  { %4210 = vsyncpa [#allocation4 + $0x1], 1 }

</bundles_post_ra>
